<compile_context>
chip_gen: v7x
topology: tpu7x:2x2x1
jax: 0.10.0
libtpu: 0.0.40
codegen_flags: <defaults>
</compile_context>

<pallas_src>
import math
import functools

import jax
import jax.numpy as jnp
from jax.experimental import pallas as pl
from jax.experimental.pallas import tpu as pltpu


def _layernorm(h, w, b, eps=1e-5):
    mu = jnp.mean(h, axis=-1, keepdims=True)
    var = jnp.mean((h - mu) ** 2, axis=-1, keepdims=True)
    return (h - mu) * jax.lax.rsqrt(var + eps) * w + b


def gpt_block_kernel(x_ref,
                     ln1_w_ref, ln1_b_ref,
                     w_q_ref, b_q_ref, w_kv_ref, b_kv_ref,
                     w_po_ref, b_po_ref,
                     ln2_w_ref, ln2_b_ref,
                     w_fc_ref, b_fc_ref,
                     w_p2_ref, b_p2_ref,
                     out_ref,
                     h1_ref, k_ref, v_ref, y_ref,
                     *, n_head, tq):
    T, C = h1_ref.shape
    hd = C // n_head
    qi = pl.program_id(1)
    q0 = pl.multiple_of(qi * tq, tq)

    # ---- per-batch prologue (first q-tile only): ln_1 over full sequence and
    # fused full-width K/V projection, cached in VMEM for all q-tiles of this
    # batch element.  (q-tile grid axis is "arbitrary" so this ordering holds.)
    @pl.when(qi == 0)
    def _():
        x_full = x_ref[0].astype(jnp.float32)                       # (T, C)
        h1 = _layernorm(x_full, ln1_w_ref[...], ln1_b_ref[...])
        h1b = h1.astype(jnp.bfloat16)
        h1_ref[...] = h1b
        kv = jnp.dot(h1b, w_kv_ref[...],
                     preferred_element_type=jnp.float32) + b_kv_ref[...]
        kv = kv.astype(jnp.bfloat16)                                # (T, 2C)
        k_ref[...] = kv[:, :C]
        v_ref[...] = kv[:, C:]

    # ---- Q projection for this tile (full-width matmul; 1/sqrt(hd) is folded
    # into w_q / b_q in the wrapper).
    x_tile = x_ref[0, pl.ds(q0, tq), :].astype(jnp.float32)         # (tq, C)
    h1_tile = h1_ref[pl.ds(q0, tq), :]                              # bf16
    q_tile = jnp.dot(h1_tile, w_q_ref[...],
                     preferred_element_type=jnp.float32) + b_q_ref[...]
    q_tile = q_tile.astype(jnp.bfloat16)                            # (tq, C)

    # additive causal mask for this tile: one add per head (no per-head
    # compare/select), finite fill value (no -inf / NaN hazards).
    rows = q0 + jax.lax.broadcasted_iota(jnp.int32, (tq, T), 0)
    cols = jax.lax.broadcasted_iota(jnp.int32, (tq, T), 1)
    mask_bias = jnp.where(rows >= cols, 0.0, -1e30).astype(jnp.float32)

    # ---- per-head attention; head outputs go straight into a (tq, C) VMEM
    # slab so the output projection is a single full-width matmul afterwards.
    for h in range(n_head):
        lo, hi = h * hd, (h + 1) * hd
        s = jax.lax.dot_general(q_tile[:, lo:hi], k_ref[:, lo:hi],
                                (((1,), (1,)), ((), ())),
                                preferred_element_type=jnp.float32)  # (tq, T)
        s = s + mask_bias
        p = jnp.exp(s - jnp.max(s, axis=-1, keepdims=True))
        # deferred normalization: scale yh rows, not the (tq,T) prob matrix.
        inv_l = pl.reciprocal(jnp.sum(p, axis=-1, keepdims=True), approx=True)
        yh = jnp.dot(p.astype(jnp.bfloat16), v_ref[:, lo:hi],
                     preferred_element_type=jnp.float32)             # (tq, hd)
        y_ref[:, lo:hi] = (yh * inv_l).astype(jnp.bfloat16)

    # fused output projection (full-width K=C) + residual
    attn = jnp.dot(y_ref[...], w_po_ref[...],
                   preferred_element_type=jnp.float32) + b_po_ref[...]
    x1 = x_tile + attn

    # ---- ln_2 + MLP (c_fc -> exact erf GELU -> c_proj) + residual ----
    h2 = _layernorm(x1, ln2_w_ref[...], ln2_b_ref[...]).astype(jnp.bfloat16)
    mid = jnp.dot(h2, w_fc_ref[...],
                  preferred_element_type=jnp.float32) + b_fc_ref[...]
    gelu = 0.5 * mid * (1.0 + jax.lax.erf(mid * (1.0 / math.sqrt(2.0))))
    mlp = jnp.dot(gelu.astype(jnp.bfloat16), w_p2_ref[...],
                  preferred_element_type=jnp.float32) + b_p2_ref[...]

    out_ref[0] = (x1 + mlp).astype(out_ref.dtype)


def _vmem_limit_bytes():
    cap = 64 * 1024 * 1024          # conservative default: v7x per-TC VMEM
    try:
        info = pltpu.get_tpu_info()
        cap = int(getattr(info, "vmem_capacity_bytes", cap))
    except Exception:
        pass
    return min(int(cap * 0.65), 100 * 1024 * 1024)


def gpt_block(x, params, n_head):
    B, T, C = x.shape
    (ln1_w, ln1_b, w_attn, b_attn, w_proj, b_proj,
     ln2_w, ln2_b, w_fc, b_fc, w_proj2, b_proj2) = params
    assert C % n_head == 0
    hd = C // n_head
    scale = 1.0 / math.sqrt(hd)
    bf16, f32 = jnp.bfloat16, jnp.float32

    # q-tile size: keep the per-step working set O(tq) in T.
    if T % 256 == 0:
        tq = 256
    elif T % 128 == 0:
        tq = 128
    else:
        tq = T
    assert T % tq == 0
    nq = T // tq

    # --- wrapper-side weight prep (cheap, XLA side) ---
    w_q = (w_attn[:, :C] * scale).astype(bf16)          # scale folded into Q
    w_kv = w_attn[:, C:].astype(bf16)                   # (C, 2C) fused K|V
    b_q = (b_attn[:, :C] * scale).astype(f32)           # (1, C)
    b_kv = b_attn[:, C:].astype(f32)                    # (1, 2C)

    weight_args = (ln1_w.astype(f32), ln1_b.astype(f32),
                   w_q, b_q, w_kv, b_kv,
                   w_proj.astype(bf16), b_proj.astype(f32),
                   ln2_w.astype(f32), ln2_b.astype(f32),
                   w_fc.astype(bf16), b_fc.astype(f32),
                   w_proj2.astype(bf16), b_proj2.astype(f32))

    # advisory cost model (real dtypes)
    flops = int(B * T * 24 * C * C + B * n_head * 4 * T * T * hd)
    transcendentals = int(B * n_head * T * T + B * T * 4 * C)
    bytes_accessed = int(2 * B * T * C * x.dtype.itemsize
                         + sum(int(w.size) * w.dtype.itemsize for w in weight_args))

    def call(single_buffer_weights):
        def wspec(a):
            imap = lambda b, qi: (0,) * a.ndim
            if single_buffer_weights:
                # constant-index-map weights don't need double buffering
                return pl.BlockSpec(a.shape, imap, pipeline_mode=pl.Buffered(1))
            return pl.BlockSpec(a.shape, imap)

        grid_spec = pltpu.PrefetchScalarGridSpec(
            num_scalar_prefetch=0,
            grid=(B, nq),
            in_specs=[pl.BlockSpec((1, T, C), lambda b, qi: (b, 0, 0))]
                     + [wspec(w) for w in weight_args],
            out_specs=pl.BlockSpec((1, tq, C), lambda b, qi: (b, qi, 0)),
            scratch_shapes=[
                pltpu.VMEM((T, C), bf16),    # ln_1(x) cache
                pltpu.VMEM((T, C), bf16),    # K cache
                pltpu.VMEM((T, C), bf16),    # V cache
                pltpu.VMEM((tq, C), bf16),   # per-tile head-output slab
            ],
        )
        return pl.pallas_call(
            functools.partial(gpt_block_kernel, n_head=n_head, tq=tq),
            out_shape=jax.ShapeDtypeStruct((B, T, C), x.dtype),
            grid_spec=grid_spec,
            compiler_params=pltpu.CompilerParams(
                # q-tile axis is "arbitrary": K/V cache is filled at qi==0 and
                # reused by later q-tiles of the same batch element.
                dimension_semantics=("parallel", "arbitrary"),
                vmem_limit_bytes=_vmem_limit_bytes(),
            ),
            cost_estimate=pl.CostEstimate(flops=flops,
                                          transcendentals=transcendentals,
                                          bytes_accessed=bytes_accessed),
        )(x, *weight_args)

    try:
        return call(True)
    except Exception:
        # this jax version rejects pipeline_mode=pl.Buffered(1); fall back to
        # default double-buffered weights (costs VMEM, not correctness).
        return call(False)


def gpt_block_reference(x, params, n_head):
    """Pure-JAX reference (mirrors the PyTorch forward, dropout=0, eval mode)."""
    (ln1_w, ln1_b, w_attn, b_attn, w_proj, b_proj,
     ln2_w, ln2_b, w_fc, b_fc, w_proj2, b_proj2) = params
    B, T, C = x.shape
    hd = C // n_head

    def ln(h, w, b):
        mu = jnp.mean(h, axis=-1, keepdims=True)
        var = jnp.mean((h - mu) ** 2, axis=-1, keepdims=True)
        return (h - mu) / jnp.sqrt(var + 1e-5) * w[0] + b[0]

    qkv = ln(x, ln1_w, ln1_b) @ w_attn + b_attn[0]
    q, k, v = jnp.split(qkv, 3, axis=-1)
    q = q.reshape(B, T, n_head, hd).transpose(0, 2, 1, 3)
    k = k.reshape(B, T, n_head, hd).transpose(0, 2, 1, 3)
    v = v.reshape(B, T, n_head, hd).transpose(0, 2, 1, 3)
    att = jnp.einsum("bhqd,bhkd->bhqk", q, k) / math.sqrt(hd)
    mask = jnp.tril(jnp.ones((T, T), dtype=bool))
    att = jnp.where(mask, att, -jnp.inf)
    att = jax.nn.softmax(att, axis=-1)
    y = jnp.einsum("bhqk,bhkd->bhqd", att, v).transpose(0, 2, 1, 3).reshape(B, T, C)
    x1 = x + (y @ w_proj + b_proj[0])
    mid = ln(x1, ln2_w, ln2_b) @ w_fc + b_fc[0]
    gelu = 0.5 * mid * (1.0 + jax.lax.erf(mid / math.sqrt(2.0)))
    return x1 + (gelu @ w_proj2 + b_proj2[0])


if __name__ == "__main__":
    # Small config consistent with GPTConfig: n_embd divisible by n_head.
    B, T, C, n_head = 2, 8, 32, 4

    key = jax.random.PRNGKey(0)
    keys = jax.random.split(key, 8)

    x = jax.random.normal(keys[0], (B, T, C), dtype=jnp.float32)

    std = 0.02
    # LayerNorm params as in nn module init: weight=1, bias=0 (bias=True).
    ln1_w = jnp.ones((1, C), jnp.float32)
    ln1_b = jnp.zeros((1, C), jnp.float32)
    ln2_w = jnp.ones((1, C), jnp.float32)
    ln2_b = jnp.zeros((1, C), jnp.float32)
    # Linear weights stored (in, out) == PyTorch weight.T
    w_attn = std * jax.random.normal(keys[1], (C, 3 * C), jnp.float32)
    b_attn = std * jax.random.normal(keys[2], (1, 3 * C), jnp.float32)
    w_proj = std * jax.random.normal(keys[3], (C, C), jnp.float32)
    b_proj = std * jax.random.normal(keys[4], (1, C), jnp.float32)
    w_fc = std * jax.random.normal(keys[5], (C, 4 * C), jnp.float32)
    b_fc = std * jax.random.normal(keys[6], (1, 4 * C), jnp.float32)
    w_proj2 = std * jax.random.normal(keys[7], (4 * C, C), jnp.float32)
    b_proj2 = jnp.zeros((1, C), jnp.float32)

    params = (ln1_w, ln1_b, w_attn, b_attn, w_proj, b_proj,
              ln2_w, ln2_b, w_fc, b_fc, w_proj2, b_proj2)

    out = gpt_block(x, params, n_head)
    out = jax.block_until_ready(out)

    ref = gpt_block_reference(x, params, n_head)
    assert out.shape == (B, T, C)
    assert bool(jnp.allclose(out, ref, atol=2e-2, rtol=2e-2)), "mismatch vs reference"

    print("KERNEL_OK")
</pallas_src>

<mosaic_0001>
module attributes {stable_mosaic.version = 11 : i64} {
  func.func @gpt_block_kernel(%arg0: i32, %arg1: i32, %arg2: memref<1x8x32xf32, #tpu.memory_space<vmem>>, %arg3: memref<1x32xf32, #tpu.memory_space<vmem>>, %arg4: memref<1x32xf32, #tpu.memory_space<vmem>>, %arg5: memref<32x32xbf16, #tpu.memory_space<vmem>>, %arg6: memref<1x32xf32, #tpu.memory_space<vmem>>, %arg7: memref<32x64xbf16, #tpu.memory_space<vmem>>, %arg8: memref<1x64xf32, #tpu.memory_space<vmem>>, %arg9: memref<32x32xbf16, #tpu.memory_space<vmem>>, %arg10: memref<1x32xf32, #tpu.memory_space<vmem>>, %arg11: memref<1x32xf32, #tpu.memory_space<vmem>>, %arg12: memref<1x32xf32, #tpu.memory_space<vmem>>, %arg13: memref<32x128xbf16, #tpu.memory_space<vmem>>, %arg14: memref<1x128xf32, #tpu.memory_space<vmem>>, %arg15: memref<128x32xbf16, #tpu.memory_space<vmem>>, %arg16: memref<1x32xf32, #tpu.memory_space<vmem>>, %arg17: memref<1x8x32xf32, #tpu.memory_space<vmem>>, %arg18: memref<8x32xbf16, #tpu.memory_space<vmem>>, %arg19: memref<8x32xbf16, #tpu.memory_space<vmem>>, %arg20: memref<8x32xbf16, #tpu.memory_space<vmem>>, %arg21: memref<8x32xbf16, #tpu.memory_space<vmem>>) attributes {dimension_semantics = [#tpu.dimension_semantics<parallel>, #tpu.dimension_semantics<arbitrary>], iteration_bounds = array<i64: 2, 1>, scalar_prefetch = 0 : i64, scratch_operands = 4 : i64, tpu.core_type = #tpu.core_type<tc>, window_params = [{transform_indices = @transform_0, window_bounds = array<i64: 1, 8, 32>}, {pipeline_mode = #tpu.pipeline_mode<synchronous>, transform_indices = @transform_1, window_bounds = array<i64: 1, 32>}, {pipeline_mode = #tpu.pipeline_mode<synchronous>, transform_indices = @transform_2, window_bounds = array<i64: 1, 32>}, {pipeline_mode = #tpu.pipeline_mode<synchronous>, transform_indices = @transform_3, window_bounds = array<i64: 32, 32>}, {pipeline_mode = #tpu.pipeline_mode<synchronous>, transform_indices = @transform_4, window_bounds = array<i64: 1, 32>}, {pipeline_mode = #tpu.pipeline_mode<synchronous>, transform_indices = @transform_5, window_bounds = array<i64: 32, 64>}, {pipeline_mode = #tpu.pipeline_mode<synchronous>, transform_indices = @transform_6, window_bounds = array<i64: 1, 64>}, {pipeline_mode = #tpu.pipeline_mode<synchronous>, transform_indices = @transform_7, window_bounds = array<i64: 32, 32>}, {pipeline_mode = #tpu.pipeline_mode<synchronous>, transform_indices = @transform_8, window_bounds = array<i64: 1, 32>}, {pipeline_mode = #tpu.pipeline_mode<synchronous>, transform_indices = @transform_9, window_bounds = array<i64: 1, 32>}, {pipeline_mode = #tpu.pipeline_mode<synchronous>, transform_indices = @transform_10, window_bounds = array<i64: 1, 32>}, {pipeline_mode = #tpu.pipeline_mode<synchronous>, transform_indices = @transform_11, window_bounds = array<i64: 32, 128>}, {pipeline_mode = #tpu.pipeline_mode<synchronous>, transform_indices = @transform_12, window_bounds = array<i64: 1, 128>}, {pipeline_mode = #tpu.pipeline_mode<synchronous>, transform_indices = @transform_13, window_bounds = array<i64: 128, 32>}, {pipeline_mode = #tpu.pipeline_mode<synchronous>, transform_indices = @transform_14, window_bounds = array<i64: 1, 32>}, {transform_indices = @transform_15, window_bounds = array<i64: 1, 8, 32>}]} {
    %c8_i32 = arith.constant 8 : i32
    %0 = arith.muli %arg1, %c8_i32 : i32
    %1 = tpu.assume_multiple %0, 8 : i32
    %c0_i32 = arith.constant 0 : i32
    %2 = arith.cmpi eq, %arg1, %c0_i32 : i32
    %3 = arith.extui %2 : i1 to i32
    %c0_i32_0 = arith.constant 0 : i32
    %4 = arith.cmpi ne, %3, %c0_i32_0 : i32
    scf.if %4 {
      %c0_78 = arith.constant 0 : index
      %c0_79 = arith.constant 0 : index
      %c0_80 = arith.constant 0 : index
      %155 = vector.load %arg2[%c0_78, %c0_79, %c0_80] : memref<1x8x32xf32, #tpu.memory_space<vmem>>, vector<1x8x32xf32>
      %156 = vector.shape_cast %155 : vector<1x8x32xf32> to vector<8x32xf32>
      %c0_81 = arith.constant 0 : index
      %c0_82 = arith.constant 0 : index
      %157 = vector.load %arg3[%c0_81, %c0_82] : memref<1x32xf32, #tpu.memory_space<vmem>>, vector<1x32xf32>
      %c0_83 = arith.constant 0 : index
      %c0_84 = arith.constant 0 : index
      %158 = vector.load %arg4[%c0_83, %c0_84] : memref<1x32xf32, #tpu.memory_space<vmem>>, vector<1x32xf32>
      %cst_85 = arith.constant dense<0.000000e+00> : vector<8xf32>
      %159 = vector.multi_reduction <add>, %156, %cst_85 [1] : vector<8x32xf32> to vector<8xf32>
      %160 = vector.shape_cast %159 : vector<8xf32> to vector<8x1xf32>
      %cst_86 = arith.constant 3.200000e+01 : f32
      %161 = vector.broadcast %cst_86 : f32 to vector<8x1xf32>
      %162 = arith.divf %160, %161 : vector<8x1xf32>
      %163 = vector.broadcast %162 : vector<8x1xf32> to vector<8x32xf32>
      %164 = arith.subf %156, %163 : vector<8x32xf32>
      %165 = arith.mulf %164, %164 : vector<8x32xf32>
      %cst_87 = arith.constant dense<0.000000e+00> : vector<8xf32>
      %166 = vector.multi_reduction <add>, %165, %cst_87 [1] : vector<8x32xf32> to vector<8xf32>
      %167 = vector.shape_cast %166 : vector<8xf32> to vector<8x1xf32>
      %cst_88 = arith.constant 3.200000e+01 : f32
      %168 = vector.broadcast %cst_88 : f32 to vector<8x1xf32>
      %169 = arith.divf %167, %168 : vector<8x1xf32>
      %170 = vector.broadcast %162 : vector<8x1xf32> to vector<8x32xf32>
      %171 = arith.subf %156, %170 : vector<8x32xf32>
      %cst_89 = arith.constant 9.99999974E-6 : f32
      %172 = vector.broadcast %cst_89 : f32 to vector<8x1xf32>
      %173 = arith.addf %169, %172 : vector<8x1xf32>
      %174 = math.rsqrt %173 : vector<8x1xf32>
      %175 = vector.broadcast %174 : vector<8x1xf32> to vector<8x32xf32>
      %176 = arith.mulf %171, %175 : vector<8x32xf32>
      %177 = vector.broadcast %157 : vector<1x32xf32> to vector<8x32xf32>
      %178 = arith.mulf %176, %177 : vector<8x32xf32>
      %179 = vector.broadcast %158 : vector<1x32xf32> to vector<8x32xf32>
      %180 = arith.addf %178, %179 : vector<8x32xf32>
      %181 = arith.truncf %180 : vector<8x32xf32> to vector<8x32xbf16>
      %c0_90 = arith.constant 0 : index
      %c0_91 = arith.constant 0 : index
      %182 = vector.load %arg18[%c0_90, %c0_91] : memref<8x32xbf16, #tpu.memory_space<vmem>>, vector<8x32xbf16>
      tpu.vector_store %arg18[%c0_90, %c0_91], %181 {strides = array<i32>} : memref<8x32xbf16, #tpu.memory_space<vmem>>, vector<8x32xbf16>,
      %c0_92 = arith.constant 0 : index
      %c0_93 = arith.constant 0 : index
      %183 = vector.load %arg7[%c0_92, %c0_93] : memref<32x64xbf16, #tpu.memory_space<vmem>>, vector<32x64xbf16>
      %cst_94 = arith.constant dense<0.000000e+00> : vector<8x64xf32>
      %184 = tpu.matmul %181, %183, %cst_94 {dimension_numbers = #tpu.dot_dimension_numbers<[1], [0], [0], [1], [0, 0, 1, 1], [], []>} : vector<8x32xbf16>, vector<32x64xbf16>, vector<8x64xf32> -> vector<8x64xf32>
      %c0_95 = arith.constant 0 : index
      %c0_96 = arith.constant 0 : index
      %185 = vector.load %arg8[%c0_95, %c0_96] : memref<1x64xf32, #tpu.memory_space<vmem>>, vector<1x64xf32>
      %186 = vector.broadcast %185 : vector<1x64xf32> to vector<8x64xf32>
      %187 = arith.addf %184, %186 : vector<8x64xf32>
      %188 = arith.truncf %187 : vector<8x64xf32> to vector<8x64xbf16>
      %189 = vector.extract_strided_slice %188 {offsets = [0, 0], sizes = [8, 32], strides = [1, 1]} : vector<8x64xbf16> to vector<8x32xbf16>
      %c0_97 = arith.constant 0 : index
      %c0_98 = arith.constant 0 : index
      %190 = vector.load %arg19[%c0_97, %c0_98] : memref<8x32xbf16, #tpu.memory_space<vmem>>, vector<8x32xbf16>
      tpu.vector_store %arg19[%c0_97, %c0_98], %189 {strides = array<i32>} : memref<8x32xbf16, #tpu.memory_space<vmem>>, vector<8x32xbf16>,
      %191 = vector.extract_strided_slice %188 {offsets = [0, 32], sizes = [8, 32], strides = [1, 1]} : vector<8x64xbf16> to vector<8x32xbf16>
      %c0_99 = arith.constant 0 : index
      %c0_100 = arith.constant 0 : index
      %192 = vector.load %arg20[%c0_99, %c0_100] : memref<8x32xbf16, #tpu.memory_space<vmem>>, vector<8x32xbf16>
      tpu.vector_store %arg20[%c0_99, %c0_100], %191 {strides = array<i32>} : memref<8x32xbf16, #tpu.memory_space<vmem>>, vector<8x32xbf16>,
    } else {
    }
    %c0 = arith.constant 0 : index
    %5 = arith.index_cast %1 : i32 to index
    %c0_1 = arith.constant 0 : index
    %6 = vector.load %arg2[%c0, %5, %c0_1] : memref<1x8x32xf32, #tpu.memory_space<vmem>>, vector<1x8x32xf32>
    %7 = vector.shape_cast %6 : vector<1x8x32xf32> to vector<8x32xf32>
    %8 = arith.index_cast %1 : i32 to index
    %c0_2 = arith.constant 0 : index
    %9 = vector.load %arg18[%8, %c0_2] : memref<8x32xbf16, #tpu.memory_space<vmem>>, vector<8x32xbf16>
    %c0_3 = arith.constant 0 : index
    %c0_4 = arith.constant 0 : index
    %10 = vector.load %arg5[%c0_3, %c0_4] : memref<32x32xbf16, #tpu.memory_space<vmem>>, vector<32x32xbf16>
    %cst = arith.constant dense<0.000000e+00> : vector<8x32xf32>
    %11 = tpu.matmul %9, %10, %cst {dimension_numbers = #tpu.dot_dimension_numbers<[1], [0], [0], [1], [0, 0, 1, 1], [], []>} : vector<8x32xbf16>, vector<32x32xbf16>, vector<8x32xf32> -> vector<8x32xf32>
    %c0_5 = arith.constant 0 : index
    %c0_6 = arith.constant 0 : index
    %12 = vector.load %arg6[%c0_5, %c0_6] : memref<1x32xf32, #tpu.memory_space<vmem>>, vector<1x32xf32>
    %13 = vector.broadcast %12 : vector<1x32xf32> to vector<8x32xf32>
    %14 = arith.addf %11, %13 : vector<8x32xf32>
    %15 = arith.truncf %14 : vector<8x32xf32> to vector<8x32xbf16>
    %16 = tpu.iota {dimensions = array<i32: 0>} : vector<8x8xi32>
    %17 = vector.broadcast %1 : i32 to vector<8x8xi32>
    %18 = arith.addi %17, %16 : vector<8x8xi32>
    %19 = tpu.iota {dimensions = array<i32: 1>} : vector<8x8xi32>
    %20 = arith.cmpi sge, %18, %19 : vector<8x8xi32>
    %cst_7 = arith.constant 0.000000e+00 : f32
    %cst_8 = arith.constant -1.000000e+30 : f32
    %21 = vector.broadcast %cst_7 : f32 to vector<8x8xf32>
    %22 = vector.broadcast %cst_8 : f32 to vector<8x8xf32>
    %23 = arith.select %20, %21, %22 : vector<8x8xi1>, vector<8x8xf32>
    %24 = vector.extract_strided_slice %15 {offsets = [0, 0], sizes = [8, 8], strides = [1, 1]} : vector<8x32xbf16> to vector<8x8xbf16>
    %c0_9 = arith.constant 0 : index
    %c0_10 = arith.constant 0 : index
    %25 = vector.load %arg19[%c0_9, %c0_10] : memref<8x32xbf16, #tpu.memory_space<vmem>>, vector<8x8xbf16>
    %cst_11 = arith.constant dense<0.000000e+00> : vector<8x8xf32>
    %26 = tpu.matmul %24, %25, %cst_11 {dimension_numbers = #tpu.dot_dimension_numbers<[1], [1], [0], [0], [0, 0, 1, 0], [], []>} : vector<8x8xbf16>, vector<8x8xbf16>, vector<8x8xf32> -> vector<8x8xf32>
    %27 = arith.addf %26, %23 : vector<8x8xf32>
    %cst_12 = arith.constant dense<0xFF800000> : vector<8xf32>
    %28 = vector.multi_reduction <maximumf>, %27, %cst_12 [1] : vector<8x8xf32> to vector<8xf32>
    %29 = vector.shape_cast %28 : vector<8xf32> to vector<8x1xf32>
    %30 = vector.broadcast %29 : vector<8x1xf32> to vector<8x8xf32>
    %31 = arith.subf %27, %30 : vector<8x8xf32>
    %32 = math.exp %31 : vector<8x8xf32>
    %cst_13 = arith.constant dense<0.000000e+00> : vector<8xf32>
    %33 = vector.multi_reduction <add>, %32, %cst_13 [1] : vector<8x8xf32> to vector<8xf32>
    %34 = vector.shape_cast %33 : vector<8xf32> to vector<8x1xf32>
    %35 = tpu.reciprocal %34 {approx = true} : vector<8x1xf32> -> vector<8x1xf32>
    %36 = arith.truncf %32 : vector<8x8xf32> to vector<8x8xbf16>
    %c0_14 = arith.constant 0 : index
    %c0_15 = arith.constant 0 : index
    %37 = vector.load %arg20[%c0_14, %c0_15] : memref<8x32xbf16, #tpu.memory_space<vmem>>, vector<8x8xbf16>
    %cst_16 = arith.constant dense<0.000000e+00> : vector<8x8xf32>
    %38 = tpu.matmul %36, %37, %cst_16 {dimension_numbers = #tpu.dot_dimension_numbers<[1], [0], [0], [1], [0, 0, 1, 1], [], []>} : vector<8x8xbf16>, vector<8x8xbf16>, vector<8x8xf32> -> vector<8x8xf32>
    %39 = vector.broadcast %35 : vector<8x1xf32> to vector<8x8xf32>
    %40 = arith.mulf %38, %39 : vector<8x8xf32>
    %41 = arith.truncf %40 : vector<8x8xf32> to vector<8x8xbf16>
    %c0_17 = arith.constant 0 : index
    %c0_18 = arith.constant 0 : index
    %42 = vector.load %arg21[%c0_17, %c0_18] : memref<8x32xbf16, #tpu.memory_space<vmem>>, vector<8x8xbf16>
    tpu.vector_store %arg21[%c0_17, %c0_18], %41 {strides = array<i32>} : memref<8x32xbf16, #tpu.memory_space<vmem>>, vector<8x8xbf16>,
    %43 = vector.extract_strided_slice %15 {offsets = [0, 8], sizes = [8, 8], strides = [1, 1]} : vector<8x32xbf16> to vector<8x8xbf16>
    %c0_19 = arith.constant 0 : index
    %c8 = arith.constant 8 : index
    %44 = vector.load %arg19[%c0_19, %c8] : memref<8x32xbf16, #tpu.memory_space<vmem>>, vector<8x8xbf16>
    %cst_20 = arith.constant dense<0.000000e+00> : vector<8x8xf32>
    %45 = tpu.matmul %43, %44, %cst_20 {dimension_numbers = #tpu.dot_dimension_numbers<[1], [1], [0], [0], [0, 0, 1, 0], [], []>} : vector<8x8xbf16>, vector<8x8xbf16>, vector<8x8xf32> -> vector<8x8xf32>
    %46 = arith.addf %45, %23 : vector<8x8xf32>
    %cst_21 = arith.constant dense<0xFF800000> : vector<8xf32>
    %47 = vector.multi_reduction <maximumf>, %46, %cst_21 [1] : vector<8x8xf32> to vector<8xf32>
    %48 = vector.shape_cast %47 : vector<8xf32> to vector<8x1xf32>
    %49 = vector.broadcast %48 : vector<8x1xf32> to vector<8x8xf32>
    %50 = arith.subf %46, %49 : vector<8x8xf32>
    %51 = math.exp %50 : vector<8x8xf32>
    %cst_22 = arith.constant dense<0.000000e+00> : vector<8xf32>
    %52 = vector.multi_reduction <add>, %51, %cst_22 [1] : vector<8x8xf32> to vector<8xf32>
    %53 = vector.shape_cast %52 : vector<8xf32> to vector<8x1xf32>
    %54 = tpu.reciprocal %53 {approx = true} : vector<8x1xf32> -> vector<8x1xf32>
    %55 = arith.truncf %51 : vector<8x8xf32> to vector<8x8xbf16>
    %c0_23 = arith.constant 0 : index
    %c8_24 = arith.constant 8 : index
    %56 = vector.load %arg20[%c0_23, %c8_24] : memref<8x32xbf16, #tpu.memory_space<vmem>>, vector<8x8xbf16>
    %cst_25 = arith.constant dense<0.000000e+00> : vector<8x8xf32>
    %57 = tpu.matmul %55, %56, %cst_25 {dimension_numbers = #tpu.dot_dimension_numbers<[1], [0], [0], [1], [0, 0, 1, 1], [], []>} : vector<8x8xbf16>, vector<8x8xbf16>, vector<8x8xf32> -> vector<8x8xf32>
    %58 = vector.broadcast %54 : vector<8x1xf32> to vector<8x8xf32>
    %59 = arith.mulf %57, %58 : vector<8x8xf32>
    %60 = arith.truncf %59 : vector<8x8xf32> to vector<8x8xbf16>
    %c0_26 = arith.constant 0 : index
    %c8_27 = arith.constant 8 : index
    %61 = vector.load %arg21[%c0_26, %c8_27] : memref<8x32xbf16, #tpu.memory_space<vmem>>, vector<8x8xbf16>
    tpu.vector_store %arg21[%c0_26, %c8_27], %60 {strides = array<i32>} : memref<8x32xbf16, #tpu.memory_space<vmem>>, vector<8x8xbf16>,
    %62 = vector.extract_strided_slice %15 {offsets = [0, 16], sizes = [8, 8], strides = [1, 1]} : vector<8x32xbf16> to vector<8x8xbf16>
    %c0_28 = arith.constant 0 : index
    %c16 = arith.constant 16 : index
    %63 = vector.load %arg19[%c0_28, %c16] : memref<8x32xbf16, #tpu.memory_space<vmem>>, vector<8x8xbf16>
    %cst_29 = arith.constant dense<0.000000e+00> : vector<8x8xf32>
    %64 = tpu.matmul %62, %63, %cst_29 {dimension_numbers = #tpu.dot_dimension_numbers<[1], [1], [0], [0], [0, 0, 1, 0], [], []>} : vector<8x8xbf16>, vector<8x8xbf16>, vector<8x8xf32> -> vector<8x8xf32>
    %65 = arith.addf %64, %23 : vector<8x8xf32>
    %cst_30 = arith.constant dense<0xFF800000> : vector<8xf32>
    %66 = vector.multi_reduction <maximumf>, %65, %cst_30 [1] : vector<8x8xf32> to vector<8xf32>
    %67 = vector.shape_cast %66 : vector<8xf32> to vector<8x1xf32>
    %68 = vector.broadcast %67 : vector<8x1xf32> to vector<8x8xf32>
    %69 = arith.subf %65, %68 : vector<8x8xf32>
    %70 = math.exp %69 : vector<8x8xf32>
    %cst_31 = arith.constant dense<0.000000e+00> : vector<8xf32>
    %71 = vector.multi_reduction <add>, %70, %cst_31 [1] : vector<8x8xf32> to vector<8xf32>
    %72 = vector.shape_cast %71 : vector<8xf32> to vector<8x1xf32>
    %73 = tpu.reciprocal %72 {approx = true} : vector<8x1xf32> -> vector<8x1xf32>
    %74 = arith.truncf %70 : vector<8x8xf32> to vector<8x8xbf16>
    %c0_32 = arith.constant 0 : index
    %c16_33 = arith.constant 16 : index
    %75 = vector.load %arg20[%c0_32, %c16_33] : memref<8x32xbf16, #tpu.memory_space<vmem>>, vector<8x8xbf16>
    %cst_34 = arith.constant dense<0.000000e+00> : vector<8x8xf32>
    %76 = tpu.matmul %74, %75, %cst_34 {dimension_numbers = #tpu.dot_dimension_numbers<[1], [0], [0], [1], [0, 0, 1, 1], [], []>} : vector<8x8xbf16>, vector<8x8xbf16>, vector<8x8xf32> -> vector<8x8xf32>
    %77 = vector.broadcast %73 : vector<8x1xf32> to vector<8x8xf32>
    %78 = arith.mulf %76, %77 : vector<8x8xf32>
    %79 = arith.truncf %78 : vector<8x8xf32> to vector<8x8xbf16>
    %c0_35 = arith.constant 0 : index
    %c16_36 = arith.constant 16 : index
    %80 = vector.load %arg21[%c0_35, %c16_36] : memref<8x32xbf16, #tpu.memory_space<vmem>>, vector<8x8xbf16>
    tpu.vector_store %arg21[%c0_35, %c16_36], %79 {strides = array<i32>} : memref<8x32xbf16, #tpu.memory_space<vmem>>, vector<8x8xbf16>,
    %81 = vector.extract_strided_slice %15 {offsets = [0, 24], sizes = [8, 8], strides = [1, 1]} : vector<8x32xbf16> to vector<8x8xbf16>
    %c0_37 = arith.constant 0 : index
    %c24 = arith.constant 24 : index
    %82 = vector.load %arg19[%c0_37, %c24] : memref<8x32xbf16, #tpu.memory_space<vmem>>, vector<8x8xbf16>
    %cst_38 = arith.constant dense<0.000000e+00> : vector<8x8xf32>
    %83 = tpu.matmul %81, %82, %cst_38 {dimension_numbers = #tpu.dot_dimension_numbers<[1], [1], [0], [0], [0, 0, 1, 0], [], []>} : vector<8x8xbf16>, vector<8x8xbf16>, vector<8x8xf32> -> vector<8x8xf32>
    %84 = arith.addf %83, %23 : vector<8x8xf32>
    %cst_39 = arith.constant dense<0xFF800000> : vector<8xf32>
    %85 = vector.multi_reduction <maximumf>, %84, %cst_39 [1] : vector<8x8xf32> to vector<8xf32>
    %86 = vector.shape_cast %85 : vector<8xf32> to vector<8x1xf32>
    %87 = vector.broadcast %86 : vector<8x1xf32> to vector<8x8xf32>
    %88 = arith.subf %84, %87 : vector<8x8xf32>
    %89 = math.exp %88 : vector<8x8xf32>
    %cst_40 = arith.constant dense<0.000000e+00> : vector<8xf32>
    %90 = vector.multi_reduction <add>, %89, %cst_40 [1] : vector<8x8xf32> to vector<8xf32>
    %91 = vector.shape_cast %90 : vector<8xf32> to vector<8x1xf32>
    %92 = tpu.reciprocal %91 {approx = true} : vector<8x1xf32> -> vector<8x1xf32>
    %93 = arith.truncf %89 : vector<8x8xf32> to vector<8x8xbf16>
    %c0_41 = arith.constant 0 : index
    %c24_42 = arith.constant 24 : index
    %94 = vector.load %arg20[%c0_41, %c24_42] : memref<8x32xbf16, #tpu.memory_space<vmem>>, vector<8x8xbf16>
    %cst_43 = arith.constant dense<0.000000e+00> : vector<8x8xf32>
    %95 = tpu.matmul %93, %94, %cst_43 {dimension_numbers = #tpu.dot_dimension_numbers<[1], [0], [0], [1], [0, 0, 1, 1], [], []>} : vector<8x8xbf16>, vector<8x8xbf16>, vector<8x8xf32> -> vector<8x8xf32>
    %96 = vector.broadcast %92 : vector<8x1xf32> to vector<8x8xf32>
    %97 = arith.mulf %95, %96 : vector<8x8xf32>
    %98 = arith.truncf %97 : vector<8x8xf32> to vector<8x8xbf16>
    %c0_44 = arith.constant 0 : index
    %c24_45 = arith.constant 24 : index
    %99 = vector.load %arg21[%c0_44, %c24_45] : memref<8x32xbf16, #tpu.memory_space<vmem>>, vector<8x8xbf16>
    tpu.vector_store %arg21[%c0_44, %c24_45], %98 {strides = array<i32>} : memref<8x32xbf16, #tpu.memory_space<vmem>>, vector<8x8xbf16>,
    %c0_46 = arith.constant 0 : index
    %c0_47 = arith.constant 0 : index
    %100 = vector.load %arg21[%c0_46, %c0_47] : memref<8x32xbf16, #tpu.memory_space<vmem>>, vector<8x32xbf16>
    %c0_48 = arith.constant 0 : index
    %c0_49 = arith.constant 0 : index
    %101 = vector.load %arg9[%c0_48, %c0_49] : memref<32x32xbf16, #tpu.memory_space<vmem>>, vector<32x32xbf16>
    %cst_50 = arith.constant dense<0.000000e+00> : vector<8x32xf32>
    %102 = tpu.matmul %100, %101, %cst_50 {dimension_numbers = #tpu.dot_dimension_numbers<[1], [0], [0], [1], [0, 0, 1, 1], [], []>} : vector<8x32xbf16>, vector<32x32xbf16>, vector<8x32xf32> -> vector<8x32xf32>
    %c0_51 = arith.constant 0 : index
    %c0_52 = arith.constant 0 : index
    %103 = vector.load %arg10[%c0_51, %c0_52] : memref<1x32xf32, #tpu.memory_space<vmem>>, vector<1x32xf32>
    %104 = vector.broadcast %103 : vector<1x32xf32> to vector<8x32xf32>
    %105 = arith.addf %102, %104 : vector<8x32xf32>
    %106 = arith.addf %7, %105 : vector<8x32xf32>
    %c0_53 = arith.constant 0 : index
    %c0_54 = arith.constant 0 : index
    %107 = vector.load %arg11[%c0_53, %c0_54] : memref<1x32xf32, #tpu.memory_space<vmem>>, vector<1x32xf32>
    %c0_55 = arith.constant 0 : index
    %c0_56 = arith.constant 0 : index
    %108 = vector.load %arg12[%c0_55, %c0_56] : memref<1x32xf32, #tpu.memory_space<vmem>>, vector<1x32xf32>
    %cst_57 = arith.constant dense<0.000000e+00> : vector<8xf32>
    %109 = vector.multi_reduction <add>, %106, %cst_57 [1] : vector<8x32xf32> to vector<8xf32>
    %110 = vector.shape_cast %109 : vector<8xf32> to vector<8x1xf32>
    %cst_58 = arith.constant 3.200000e+01 : f32
    %111 = vector.broadcast %cst_58 : f32 to vector<8x1xf32>
    %112 = arith.divf %110, %111 : vector<8x1xf32>
    %113 = vector.broadcast %112 : vector<8x1xf32> to vector<8x32xf32>
    %114 = arith.subf %106, %113 : vector<8x32xf32>
    %115 = arith.mulf %114, %114 : vector<8x32xf32>
    %cst_59 = arith.constant dense<0.000000e+00> : vector<8xf32>
    %116 = vector.multi_reduction <add>, %115, %cst_59 [1] : vector<8x32xf32> to vector<8xf32>
    %117 = vector.shape_cast %116 : vector<8xf32> to vector<8x1xf32>
    %cst_60 = arith.constant 3.200000e+01 : f32
    %118 = vector.broadcast %cst_60 : f32 to vector<8x1xf32>
    %119 = arith.divf %117, %118 : vector<8x1xf32>
    %120 = vector.broadcast %112 : vector<8x1xf32> to vector<8x32xf32>
    %121 = arith.subf %106, %120 : vector<8x32xf32>
    %cst_61 = arith.constant 9.99999974E-6 : f32
    %122 = vector.broadcast %cst_61 : f32 to vector<8x1xf32>
    %123 = arith.addf %119, %122 : vector<8x1xf32>
    %124 = math.rsqrt %123 : vector<8x1xf32>
    %125 = vector.broadcast %124 : vector<8x1xf32> to vector<8x32xf32>
    %126 = arith.mulf %121, %125 : vector<8x32xf32>
    %127 = vector.broadcast %107 : vector<1x32xf32> to vector<8x32xf32>
    %128 = arith.mulf %126, %127 : vector<8x32xf32>
    %129 = vector.broadcast %108 : vector<1x32xf32> to vector<8x32xf32>
    %130 = arith.addf %128, %129 : vector<8x32xf32>
    %131 = arith.truncf %130 : vector<8x32xf32> to vector<8x32xbf16>
    %c0_62 = arith.constant 0 : index
    %c0_63 = arith.constant 0 : index
    %132 = vector.load %arg13[%c0_62, %c0_63] : memref<32x128xbf16, #tpu.memory_space<vmem>>, vector<32x128xbf16>
    %cst_64 = arith.constant dense<0.000000e+00> : vector<8x128xf32>
    %133 = tpu.matmul %131, %132, %cst_64 {dimension_numbers = #tpu.dot_dimension_numbers<[1], [0], [0], [1], [0, 0, 1, 1], [], []>} : vector<8x32xbf16>, vector<32x128xbf16>, vector<8x128xf32> -> vector<8x128xf32>
    %c0_65 = arith.constant 0 : index
    %c0_66 = arith.constant 0 : index
    %134 = vector.load %arg14[%c0_65, %c0_66] : memref<1x128xf32, #tpu.memory_space<vmem>>, vector<1x128xf32>
    %135 = vector.broadcast %134 : vector<1x128xf32> to vector<8x128xf32>
    %136 = arith.addf %133, %135 : vector<8x128xf32>
    %cst_67 = arith.constant 5.000000e-01 : f32
    %137 = vector.broadcast %cst_67 : f32 to vector<8x128xf32>
    %138 = arith.mulf %137, %136 : vector<8x128xf32>
    %cst_68 = arith.constant 0.707106769 : f32
    %139 = vector.broadcast %cst_68 : f32 to vector<8x128xf32>
    %140 = arith.mulf %136, %139 : vector<8x128xf32>
    %141 = math.erf %140 : vector<8x128xf32>
    %cst_69 = arith.constant 1.000000e+00 : f32
    %142 = vector.broadcast %cst_69 : f32 to vector<8x128xf32>
    %143 = arith.addf %142, %141 : vector<8x128xf32>
    %144 = arith.mulf %138, %143 : vector<8x128xf32>
    %145 = arith.truncf %144 : vector<8x128xf32> to vector<8x128xbf16>
    %c0_70 = arith.constant 0 : index
    %c0_71 = arith.constant 0 : index
    %146 = vector.load %arg15[%c0_70, %c0_71] : memref<128x32xbf16, #tpu.memory_space<vmem>>, vector<128x32xbf16>
    %cst_72 = arith.constant dense<0.000000e+00> : vector<8x32xf32>
    %147 = tpu.matmul %145, %146, %cst_72 {dimension_numbers = #tpu.dot_dimension_numbers<[1], [0], [0], [1], [0, 0, 1, 1], [], []>} : vector<8x128xbf16>, vector<128x32xbf16>, vector<8x32xf32> -> vector<8x32xf32>
    %c0_73 = arith.constant 0 : index
    %c0_74 = arith.constant 0 : index
    %148 = vector.load %arg16[%c0_73, %c0_74] : memref<1x32xf32, #tpu.memory_space<vmem>>, vector<1x32xf32>
    %149 = vector.broadcast %148 : vector<1x32xf32> to vector<8x32xf32>
    %150 = arith.addf %147, %149 : vector<8x32xf32>
    %151 = arith.addf %106, %150 : vector<8x32xf32>
    %c0_75 = arith.constant 0 : index
    %c0_76 = arith.constant 0 : index
    %c0_77 = arith.constant 0 : index
    %152 = vector.load %arg17[%c0_75, %c0_76, %c0_77] : memref<1x8x32xf32, #tpu.memory_space<vmem>>, vector<1x8x32xf32>
    %153 = vector.shape_cast %152 : vector<1x8x32xf32> to vector<8x32xf32>
    %154 = vector.shape_cast %151 : vector<8x32xf32> to vector<1x8x32xf32>
    tpu.vector_store %arg17[%c0_75, %c0_76, %c0_77], %154 {strides = array<i32>} : memref<1x8x32xf32, #tpu.memory_space<vmem>>, vector<1x8x32xf32>,
    return
  }
  func.func @transform_0(%arg0: i32, %arg1: i32) -> (i32, i32, i32) {
    %c0_i32 = arith.constant 0 : i32
    %c0_i32_0 = arith.constant 0 : i32
    %c0_i32_1 = arith.constant 0 : i32
    return %arg0, %c0_i32, %c0_i32_0 : i32, i32, i32
  }
  func.func @transform_1(%arg0: i32, %arg1: i32) -> (i32, i32) {
    %c0_i32 = arith.constant 0 : i32
    %c0_i32_0 = arith.constant 0 : i32
    %c0_i32_1 = arith.constant 0 : i32
    return %c0_i32, %c0_i32_0 : i32, i32
  }
  func.func @transform_2(%arg0: i32, %arg1: i32) -> (i32, i32) {
    %c0_i32 = arith.constant 0 : i32
    %c0_i32_0 = arith.constant 0 : i32
    %c0_i32_1 = arith.constant 0 : i32
    return %c0_i32, %c0_i32_0 : i32, i32
  }
  func.func @transform_3(%arg0: i32, %arg1: i32) -> (i32, i32) {
    %c0_i32 = arith.constant 0 : i32
    %c0_i32_0 = arith.constant 0 : i32
    %c0_i32_1 = arith.constant 0 : i32
    return %c0_i32, %c0_i32_0 : i32, i32
  }
  func.func @transform_4(%arg0: i32, %arg1: i32) -> (i32, i32) {
    %c0_i32 = arith.constant 0 : i32
    %c0_i32_0 = arith.constant 0 : i32
    %c0_i32_1 = arith.constant 0 : i32
    return %c0_i32, %c0_i32_0 : i32, i32
  }
  func.func @transform_5(%arg0: i32, %arg1: i32) -> (i32, i32) {
    %c0_i32 = arith.constant 0 : i32
    %c0_i32_0 = arith.constant 0 : i32
    %c0_i32_1 = arith.constant 0 : i32
    return %c0_i32, %c0_i32_0 : i32, i32
  }
  func.func @transform_6(%arg0: i32, %arg1: i32) -> (i32, i32) {
    %c0_i32 = arith.constant 0 : i32
    %c0_i32_0 = arith.constant 0 : i32
    %c0_i32_1 = arith.constant 0 : i32
    return %c0_i32, %c0_i32_0 : i32, i32
  }
  func.func @transform_7(%arg0: i32, %arg1: i32) -> (i32, i32) {
    %c0_i32 = arith.constant 0 : i32
    %c0_i32_0 = arith.constant 0 : i32
    %c0_i32_1 = arith.constant 0 : i32
    return %c0_i32, %c0_i32_0 : i32, i32
  }
  func.func @transform_8(%arg0: i32, %arg1: i32) -> (i32, i32) {
    %c0_i32 = arith.constant 0 : i32
    %c0_i32_0 = arith.constant 0 : i32
    %c0_i32_1 = arith.constant 0 : i32
    return %c0_i32, %c0_i32_0 : i32, i32
  }
  func.func @transform_9(%arg0: i32, %arg1: i32) -> (i32, i32) {
    %c0_i32 = arith.constant 0 : i32
    %c0_i32_0 = arith.constant 0 : i32
    %c0_i32_1 = arith.constant 0 : i32
    return %c0_i32, %c0_i32_0 : i32, i32
  }
  func.func @transform_10(%arg0: i32, %arg1: i32) -> (i32, i32) {
    %c0_i32 = arith.constant 0 : i32
    %c0_i32_0 = arith.constant 0 : i32
    %c0_i32_1 = arith.constant 0 : i32
    return %c0_i32, %c0_i32_0 : i32, i32
  }
  func.func @transform_11(%arg0: i32, %arg1: i32) -> (i32, i32) {
    %c0_i32 = arith.constant 0 : i32
    %c0_i32_0 = arith.constant 0 : i32
    %c0_i32_1 = arith.constant 0 : i32
    return %c0_i32, %c0_i32_0 : i32, i32
  }
  func.func @transform_12(%arg0: i32, %arg1: i32) -> (i32, i32) {
    %c0_i32 = arith.constant 0 : i32
    %c0_i32_0 = arith.constant 0 : i32
    %c0_i32_1 = arith.constant 0 : i32
    return %c0_i32, %c0_i32_0 : i32, i32
  }
  func.func @transform_13(%arg0: i32, %arg1: i32) -> (i32, i32) {
    %c0_i32 = arith.constant 0 : i32
    %c0_i32_0 = arith.constant 0 : i32
    %c0_i32_1 = arith.constant 0 : i32
    return %c0_i32, %c0_i32_0 : i32, i32
  }
  func.func @transform_14(%arg0: i32, %arg1: i32) -> (i32, i32) {
    %c0_i32 = arith.constant 0 : i32
    %c0_i32_0 = arith.constant 0 : i32
    %c0_i32_1 = arith.constant 0 : i32
    return %c0_i32, %c0_i32_0 : i32, i32
  }
  func.func @transform_15(%arg0: i32, %arg1: i32) -> (i32, i32, i32) {
    %c0_i32 = arith.constant 0 : i32
    %c0_i32_0 = arith.constant 0 : i32
    return %arg0, %arg1, %c0_i32 : i32, i32, i32
  }
}

module attributes {stable_mosaic.version = 11 : i64} {
  func.func @gpt_block_kernel(%arg0: i32, %arg1: i32, %arg2: memref<1x8x32xf32, #tpu.memory_space<vmem>>, %arg3: memref<1x32xf32, #tpu.memory_space<vmem>>, %arg4: memref<1x32xf32, #tpu.memory_space<vmem>>, %arg5: memref<32x32xbf16, #tpu.memory_space<vmem>>, %arg6: memref<1x32xf32, #tpu.memory_space<vmem>>, %arg7: memref<32x64xbf16, #tpu.memory_space<vmem>>, %arg8: memref<1x64xf32, #tpu.memory_space<vmem>>, %arg9: memref<32x32xbf16, #tpu.memory_space<vmem>>, %arg10: memref<1x32xf32, #tpu.memory_space<vmem>>, %arg11: memref<1x32xf32, #tpu.memory_space<vmem>>, %arg12: memref<1x32xf32, #tpu.memory_space<vmem>>, %arg13: memref<32x128xbf16, #tpu.memory_space<vmem>>, %arg14: memref<1x128xf32, #tpu.memory_space<vmem>>, %arg15: memref<128x32xbf16, #tpu.memory_space<vmem>>, %arg16: memref<1x32xf32, #tpu.memory_space<vmem>>, %arg17: memref<1x8x32xf32, #tpu.memory_space<vmem>>, %arg18: memref<8x32xbf16, #tpu.memory_space<vmem>>, %arg19: memref<8x32xbf16, #tpu.memory_space<vmem>>, %arg20: memref<8x32xbf16, #tpu.memory_space<vmem>>, %arg21: memref<8x32xbf16, #tpu.memory_space<vmem>>) attributes {dimension_semantics = [#tpu.dimension_semantics<parallel>, #tpu.dimension_semantics<arbitrary>], iteration_bounds = array<i64: 2, 1>, scalar_prefetch = 0 : i64, scratch_operands = 4 : i64, tpu.core_type = #tpu.core_type<tc>, window_params = [{transform_indices = @transform_0, window_bounds = array<i64: 1, 8, 32>}, {pipeline_mode = #tpu.pipeline_mode<synchronous>, transform_indices = @transform_1, window_bounds = array<i64: 1, 32>}, {pipeline_mode = #tpu.pipeline_mode<synchronous>, transform_indices = @transform_2, window_bounds = array<i64: 1, 32>}, {pipeline_mode = #tpu.pipeline_mode<synchronous>, transform_indices = @transform_3, window_bounds = array<i64: 32, 32>}, {pipeline_mode = #tpu.pipeline_mode<synchronous>, transform_indices = @transform_4, window_bounds = array<i64: 1, 32>}, {pipeline_mode = #tpu.pipeline_mode<synchronous>, transform_indices = @transform_5, window_bounds = array<i64: 32, 64>}, {pipeline_mode = #tpu.pipeline_mode<synchronous>, transform_indices = @transform_6, window_bounds = array<i64: 1, 64>}, {pipeline_mode = #tpu.pipeline_mode<synchronous>, transform_indices = @transform_7, window_bounds = array<i64: 32, 32>}, {pipeline_mode = #tpu.pipeline_mode<synchronous>, transform_indices = @transform_8, window_bounds = array<i64: 1, 32>}, {pipeline_mode = #tpu.pipeline_mode<synchronous>, transform_indices = @transform_9, window_bounds = array<i64: 1, 32>}, {pipeline_mode = #tpu.pipeline_mode<synchronous>, transform_indices = @transform_10, window_bounds = array<i64: 1, 32>}, {pipeline_mode = #tpu.pipeline_mode<synchronous>, transform_indices = @transform_11, window_bounds = array<i64: 32, 128>}, {pipeline_mode = #tpu.pipeline_mode<synchronous>, transform_indices = @transform_12, window_bounds = array<i64: 1, 128>}, {pipeline_mode = #tpu.pipeline_mode<synchronous>, transform_indices = @transform_13, window_bounds = array<i64: 128, 32>}, {pipeline_mode = #tpu.pipeline_mode<synchronous>, transform_indices = @transform_14, window_bounds = array<i64: 1, 32>}, {transform_indices = @transform_15, window_bounds = array<i64: 1, 8, 32>}]} {
    %c8_i32 = arith.constant 8 : i32
    %0 = arith.muli %arg1, %c8_i32 : i32
    %1 = tpu.assume_multiple %0, 8 : i32
    %c0_i32 = arith.constant 0 : i32
    %2 = arith.cmpi eq, %arg1, %c0_i32 : i32
    %3 = arith.extui %2 : i1 to i32
    %c0_i32_0 = arith.constant 0 : i32
    %4 = arith.cmpi ne, %3, %c0_i32_0 : i32
    scf.if %4 {
      %c0_78 = arith.constant 0 : index
      %c0_79 = arith.constant 0 : index
      %c0_80 = arith.constant 0 : index
      %155 = vector.load %arg2[%c0_78, %c0_79, %c0_80] : memref<1x8x32xf32, #tpu.memory_space<vmem>>, vector<1x8x32xf32>
      %156 = vector.shape_cast %155 : vector<1x8x32xf32> to vector<8x32xf32>
      %c0_81 = arith.constant 0 : index
      %c0_82 = arith.constant 0 : index
      %157 = vector.load %arg3[%c0_81, %c0_82] : memref<1x32xf32, #tpu.memory_space<vmem>>, vector<1x32xf32>
      %c0_83 = arith.constant 0 : index
      %c0_84 = arith.constant 0 : index
      %158 = vector.load %arg4[%c0_83, %c0_84] : memref<1x32xf32, #tpu.memory_space<vmem>>, vector<1x32xf32>
      %cst_85 = arith.constant dense<0.000000e+00> : vector<8xf32>
      %159 = vector.multi_reduction <add>, %156, %cst_85 [1] : vector<8x32xf32> to vector<8xf32>
      %160 = vector.shape_cast %159 : vector<8xf32> to vector<8x1xf32>
      %cst_86 = arith.constant 3.200000e+01 : f32
      %161 = vector.broadcast %cst_86 : f32 to vector<8x1xf32>
      %162 = arith.divf %160, %161 : vector<8x1xf32>
      %163 = vector.broadcast %162 : vector<8x1xf32> to vector<8x32xf32>
      %164 = arith.subf %156, %163 : vector<8x32xf32>
      %165 = arith.mulf %164, %164 : vector<8x32xf32>
      %cst_87 = arith.constant dense<0.000000e+00> : vector<8xf32>
      %166 = vector.multi_reduction <add>, %165, %cst_87 [1] : vector<8x32xf32> to vector<8xf32>
      %167 = vector.shape_cast %166 : vector<8xf32> to vector<8x1xf32>
      %cst_88 = arith.constant 3.200000e+01 : f32
      %168 = vector.broadcast %cst_88 : f32 to vector<8x1xf32>
      %169 = arith.divf %167, %168 : vector<8x1xf32>
      %170 = vector.broadcast %162 : vector<8x1xf32> to vector<8x32xf32>
      %171 = arith.subf %156, %170 : vector<8x32xf32>
      %cst_89 = arith.constant 9.99999974E-6 : f32
      %172 = vector.broadcast %cst_89 : f32 to vector<8x1xf32>
      %173 = arith.addf %169, %172 : vector<8x1xf32>
      %174 = math.rsqrt %173 : vector<8x1xf32>
      %175 = vector.broadcast %174 : vector<8x1xf32> to vector<8x32xf32>
      %176 = arith.mulf %171, %175 : vector<8x32xf32>
      %177 = vector.broadcast %157 : vector<1x32xf32> to vector<8x32xf32>
      %178 = arith.mulf %176, %177 : vector<8x32xf32>
      %179 = vector.broadcast %158 : vector<1x32xf32> to vector<8x32xf32>
      %180 = arith.addf %178, %179 : vector<8x32xf32>
      %181 = arith.truncf %180 : vector<8x32xf32> to vector<8x32xbf16>
      %c0_90 = arith.constant 0 : index
      %c0_91 = arith.constant 0 : index
      %182 = vector.load %arg18[%c0_90, %c0_91] : memref<8x32xbf16, #tpu.memory_space<vmem>>, vector<8x32xbf16>
      tpu.vector_store %arg18[%c0_90, %c0_91], %181 {strides = array<i32>} : memref<8x32xbf16, #tpu.memory_space<vmem>>, vector<8x32xbf16>,
      %c0_92 = arith.constant 0 : index
      %c0_93 = arith.constant 0 : index
      %183 = vector.load %arg7[%c0_92, %c0_93] : memref<32x64xbf16, #tpu.memory_space<vmem>>, vector<32x64xbf16>
      %cst_94 = arith.constant dense<0.000000e+00> : vector<8x64xf32>
      %184 = tpu.matmul %181, %183, %cst_94 {dimension_numbers = #tpu.dot_dimension_numbers<[1], [0], [0], [1], [0, 0, 1, 1], [], []>} : vector<8x32xbf16>, vector<32x64xbf16>, vector<8x64xf32> -> vector<8x64xf32>
      %c0_95 = arith.constant 0 : index
      %c0_96 = arith.constant 0 : index
      %185 = vector.load %arg8[%c0_95, %c0_96] : memref<1x64xf32, #tpu.memory_space<vmem>>, vector<1x64xf32>
      %186 = vector.broadcast %185 : vector<1x64xf32> to vector<8x64xf32>
      %187 = arith.addf %184, %186 : vector<8x64xf32>
      %188 = arith.truncf %187 : vector<8x64xf32> to vector<8x64xbf16>
      %189 = vector.extract_strided_slice %188 {offsets = [0, 0], sizes = [8, 32], strides = [1, 1]} : vector<8x64xbf16> to vector<8x32xbf16>
      %c0_97 = arith.constant 0 : index
      %c0_98 = arith.constant 0 : index
      %190 = vector.load %arg19[%c0_97, %c0_98] : memref<8x32xbf16, #tpu.memory_space<vmem>>, vector<8x32xbf16>
      tpu.vector_store %arg19[%c0_97, %c0_98], %189 {strides = array<i32>} : memref<8x32xbf16, #tpu.memory_space<vmem>>, vector<8x32xbf16>,
      %191 = vector.extract_strided_slice %188 {offsets = [0, 32], sizes = [8, 32], strides = [1, 1]} : vector<8x64xbf16> to vector<8x32xbf16>
      %c0_99 = arith.constant 0 : index
      %c0_100 = arith.constant 0 : index
      %192 = vector.load %arg20[%c0_99, %c0_100] : memref<8x32xbf16, #tpu.memory_space<vmem>>, vector<8x32xbf16>
      tpu.vector_store %arg20[%c0_99, %c0_100], %191 {strides = array<i32>} : memref<8x32xbf16, #tpu.memory_space<vmem>>, vector<8x32xbf16>,
    } else {
    }
    %c0 = arith.constant 0 : index
    %5 = arith.index_cast %1 : i32 to index
    %c0_1 = arith.constant 0 : index
    %6 = vector.load %arg2[%c0, %5, %c0_1] : memref<1x8x32xf32, #tpu.memory_space<vmem>>, vector<1x8x32xf32>
    %7 = vector.shape_cast %6 : vector<1x8x32xf32> to vector<8x32xf32>
    %8 = arith.index_cast %1 : i32 to index
    %c0_2 = arith.constant 0 : index
    %9 = vector.load %arg18[%8, %c0_2] : memref<8x32xbf16, #tpu.memory_space<vmem>>, vector<8x32xbf16>
    %c0_3 = arith.constant 0 : index
    %c0_4 = arith.constant 0 : index
    %10 = vector.load %arg5[%c0_3, %c0_4] : memref<32x32xbf16, #tpu.memory_space<vmem>>, vector<32x32xbf16>
    %cst = arith.constant dense<0.000000e+00> : vector<8x32xf32>
    %11 = tpu.matmul %9, %10, %cst {dimension_numbers = #tpu.dot_dimension_numbers<[1], [0], [0], [1], [0, 0, 1, 1], [], []>} : vector<8x32xbf16>, vector<32x32xbf16>, vector<8x32xf32> -> vector<8x32xf32>
    %c0_5 = arith.constant 0 : index
    %c0_6 = arith.constant 0 : index
    %12 = vector.load %arg6[%c0_5, %c0_6] : memref<1x32xf32, #tpu.memory_space<vmem>>, vector<1x32xf32>
    %13 = vector.broadcast %12 : vector<1x32xf32> to vector<8x32xf32>
    %14 = arith.addf %11, %13 : vector<8x32xf32>
    %15 = arith.truncf %14 : vector<8x32xf32> to vector<8x32xbf16>
    %16 = tpu.iota {dimensions = array<i32: 0>} : vector<8x8xi32>
    %17 = vector.broadcast %1 : i32 to vector<8x8xi32>
    %18 = arith.addi %17, %16 : vector<8x8xi32>
    %19 = tpu.iota {dimensions = array<i32: 1>} : vector<8x8xi32>
    %20 = arith.cmpi sge, %18, %19 : vector<8x8xi32>
    %cst_7 = arith.constant 0.000000e+00 : f32
    %cst_8 = arith.constant -1.000000e+30 : f32
    %21 = vector.broadcast %cst_7 : f32 to vector<8x8xf32>
    %22 = vector.broadcast %cst_8 : f32 to vector<8x8xf32>
    %23 = arith.select %20, %21, %22 : vector<8x8xi1>, vector<8x8xf32>
    %24 = vector.extract_strided_slice %15 {offsets = [0, 0], sizes = [8, 8], strides = [1, 1]} : vector<8x32xbf16> to vector<8x8xbf16>
    %c0_9 = arith.constant 0 : index
    %c0_10 = arith.constant 0 : index
    %25 = vector.load %arg19[%c0_9, %c0_10] : memref<8x32xbf16, #tpu.memory_space<vmem>>, vector<8x8xbf16>
    %cst_11 = arith.constant dense<0.000000e+00> : vector<8x8xf32>
    %26 = tpu.matmul %24, %25, %cst_11 {dimension_numbers = #tpu.dot_dimension_numbers<[1], [1], [0], [0], [0, 0, 1, 0], [], []>} : vector<8x8xbf16>, vector<8x8xbf16>, vector<8x8xf32> -> vector<8x8xf32>
    %27 = arith.addf %26, %23 : vector<8x8xf32>
    %cst_12 = arith.constant dense<0xFF800000> : vector<8xf32>
    %28 = vector.multi_reduction <maximumf>, %27, %cst_12 [1] : vector<8x8xf32> to vector<8xf32>
    %29 = vector.shape_cast %28 : vector<8xf32> to vector<8x1xf32>
    %30 = vector.broadcast %29 : vector<8x1xf32> to vector<8x8xf32>
    %31 = arith.subf %27, %30 : vector<8x8xf32>
    %32 = math.exp %31 : vector<8x8xf32>
    %cst_13 = arith.constant dense<0.000000e+00> : vector<8xf32>
    %33 = vector.multi_reduction <add>, %32, %cst_13 [1] : vector<8x8xf32> to vector<8xf32>
    %34 = vector.shape_cast %33 : vector<8xf32> to vector<8x1xf32>
    %35 = tpu.reciprocal %34 {approx = true} : vector<8x1xf32> -> vector<8x1xf32>
    %36 = arith.truncf %32 : vector<8x8xf32> to vector<8x8xbf16>
    %c0_14 = arith.constant 0 : index
    %c0_15 = arith.constant 0 : index
    %37 = vector.load %arg20[%c0_14, %c0_15] : memref<8x32xbf16, #tpu.memory_space<vmem>>, vector<8x8xbf16>
    %cst_16 = arith.constant dense<0.000000e+00> : vector<8x8xf32>
    %38 = tpu.matmul %36, %37, %cst_16 {dimension_numbers = #tpu.dot_dimension_numbers<[1], [0], [0], [1], [0, 0, 1, 1], [], []>} : vector<8x8xbf16>, vector<8x8xbf16>, vector<8x8xf32> -> vector<8x8xf32>
    %39 = vector.broadcast %35 : vector<8x1xf32> to vector<8x8xf32>
    %40 = arith.mulf %38, %39 : vector<8x8xf32>
    %41 = arith.truncf %40 : vector<8x8xf32> to vector<8x8xbf16>
    %c0_17 = arith.constant 0 : index
    %c0_18 = arith.constant 0 : index
    %42 = vector.load %arg21[%c0_17, %c0_18] : memref<8x32xbf16, #tpu.memory_space<vmem>>, vector<8x8xbf16>
    tpu.vector_store %arg21[%c0_17, %c0_18], %41 {strides = array<i32>} : memref<8x32xbf16, #tpu.memory_space<vmem>>, vector<8x8xbf16>,
    %43 = vector.extract_strided_slice %15 {offsets = [0, 8], sizes = [8, 8], strides = [1, 1]} : vector<8x32xbf16> to vector<8x8xbf16>
    %c0_19 = arith.constant 0 : index
    %c8 = arith.constant 8 : index
    %44 = vector.load %arg19[%c0_19, %c8] : memref<8x32xbf16, #tpu.memory_space<vmem>>, vector<8x8xbf16>
    %cst_20 = arith.constant dense<0.000000e+00> : vector<8x8xf32>
    %45 = tpu.matmul %43, %44, %cst_20 {dimension_numbers = #tpu.dot_dimension_numbers<[1], [1], [0], [0], [0, 0, 1, 0], [], []>} : vector<8x8xbf16>, vector<8x8xbf16>, vector<8x8xf32> -> vector<8x8xf32>
    %46 = arith.addf %45, %23 : vector<8x8xf32>
    %cst_21 = arith.constant dense<0xFF800000> : vector<8xf32>
    %47 = vector.multi_reduction <maximumf>, %46, %cst_21 [1] : vector<8x8xf32> to vector<8xf32>
    %48 = vector.shape_cast %47 : vector<8xf32> to vector<8x1xf32>
    %49 = vector.broadcast %48 : vector<8x1xf32> to vector<8x8xf32>
    %50 = arith.subf %46, %49 : vector<8x8xf32>
    %51 = math.exp %50 : vector<8x8xf32>
    %cst_22 = arith.constant dense<0.000000e+00> : vector<8xf32>
    %52 = vector.multi_reduction <add>, %51, %cst_22 [1] : vector<8x8xf32> to vector<8xf32>
    %53 = vector.shape_cast %52 : vector<8xf32> to vector<8x1xf32>
    %54 = tpu.reciprocal %53 {approx = true} : vector<8x1xf32> -> vector<8x1xf32>
    %55 = arith.truncf %51 : vector<8x8xf32> to vector<8x8xbf16>
    %c0_23 = arith.constant 0 : index
    %c8_24 = arith.constant 8 : index
    %56 = vector.load %arg20[%c0_23, %c8_24] : memref<8x32xbf16, #tpu.memory_space<vmem>>, vector<8x8xbf16>
    %cst_25 = arith.constant dense<0.000000e+00> : vector<8x8xf32>
    %57 = tpu.matmul %55, %56, %cst_25 {dimension_numbers = #tpu.dot_dimension_numbers<[1], [0], [0], [1], [0, 0, 1, 1], [], []>} : vector<8x8xbf16>, vector<8x8xbf16>, vector<8x8xf32> -> vector<8x8xf32>
    %58 = vector.broadcast %54 : vector<8x1xf32> to vector<8x8xf32>
    %59 = arith.mulf %57, %58 : vector<8x8xf32>
    %60 = arith.truncf %59 : vector<8x8xf32> to vector<8x8xbf16>
    %c0_26 = arith.constant 0 : index
    %c8_27 = arith.constant 8 : index
    %61 = vector.load %arg21[%c0_26, %c8_27] : memref<8x32xbf16, #tpu.memory_space<vmem>>, vector<8x8xbf16>
    tpu.vector_store %arg21[%c0_26, %c8_27], %60 {strides = array<i32>} : memref<8x32xbf16, #tpu.memory_space<vmem>>, vector<8x8xbf16>,
    %62 = vector.extract_strided_slice %15 {offsets = [0, 16], sizes = [8, 8], strides = [1, 1]} : vector<8x32xbf16> to vector<8x8xbf16>
    %c0_28 = arith.constant 0 : index
    %c16 = arith.constant 16 : index
    %63 = vector.load %arg19[%c0_28, %c16] : memref<8x32xbf16, #tpu.memory_space<vmem>>, vector<8x8xbf16>
    %cst_29 = arith.constant dense<0.000000e+00> : vector<8x8xf32>
    %64 = tpu.matmul %62, %63, %cst_29 {dimension_numbers = #tpu.dot_dimension_numbers<[1], [1], [0], [0], [0, 0, 1, 0], [], []>} : vector<8x8xbf16>, vector<8x8xbf16>, vector<8x8xf32> -> vector<8x8xf32>
    %65 = arith.addf %64, %23 : vector<8x8xf32>
    %cst_30 = arith.constant dense<0xFF800000> : vector<8xf32>
    %66 = vector.multi_reduction <maximumf>, %65, %cst_30 [1] : vector<8x8xf32> to vector<8xf32>
    %67 = vector.shape_cast %66 : vector<8xf32> to vector<8x1xf32>
    %68 = vector.broadcast %67 : vector<8x1xf32> to vector<8x8xf32>
    %69 = arith.subf %65, %68 : vector<8x8xf32>
    %70 = math.exp %69 : vector<8x8xf32>
    %cst_31 = arith.constant dense<0.000000e+00> : vector<8xf32>
    %71 = vector.multi_reduction <add>, %70, %cst_31 [1] : vector<8x8xf32> to vector<8xf32>
    %72 = vector.shape_cast %71 : vector<8xf32> to vector<8x1xf32>
    %73 = tpu.reciprocal %72 {approx = true} : vector<8x1xf32> -> vector<8x1xf32>
    %74 = arith.truncf %70 : vector<8x8xf32> to vector<8x8xbf16>
    %c0_32 = arith.constant 0 : index
    %c16_33 = arith.constant 16 : index
    %75 = vector.load %arg20[%c0_32, %c16_33] : memref<8x32xbf16, #tpu.memory_space<vmem>>, vector<8x8xbf16>
    %cst_34 = arith.constant dense<0.000000e+00> : vector<8x8xf32>
    %76 = tpu.matmul %74, %75, %cst_34 {dimension_numbers = #tpu.dot_dimension_numbers<[1], [0], [0], [1], [0, 0, 1, 1], [], []>} : vector<8x8xbf16>, vector<8x8xbf16>, vector<8x8xf32> -> vector<8x8xf32>
    %77 = vector.broadcast %73 : vector<8x1xf32> to vector<8x8xf32>
    %78 = arith.mulf %76, %77 : vector<8x8xf32>
    %79 = arith.truncf %78 : vector<8x8xf32> to vector<8x8xbf16>
    %c0_35 = arith.constant 0 : index
    %c16_36 = arith.constant 16 : index
    %80 = vector.load %arg21[%c0_35, %c16_36] : memref<8x32xbf16, #tpu.memory_space<vmem>>, vector<8x8xbf16>
    tpu.vector_store %arg21[%c0_35, %c16_36], %79 {strides = array<i32>} : memref<8x32xbf16, #tpu.memory_space<vmem>>, vector<8x8xbf16>,
    %81 = vector.extract_strided_slice %15 {offsets = [0, 24], sizes = [8, 8], strides = [1, 1]} : vector<8x32xbf16> to vector<8x8xbf16>
    %c0_37 = arith.constant 0 : index
    %c24 = arith.constant 24 : index
    %82 = vector.load %arg19[%c0_37, %c24] : memref<8x32xbf16, #tpu.memory_space<vmem>>, vector<8x8xbf16>
    %cst_38 = arith.constant dense<0.000000e+00> : vector<8x8xf32>
    %83 = tpu.matmul %81, %82, %cst_38 {dimension_numbers = #tpu.dot_dimension_numbers<[1], [1], [0], [0], [0, 0, 1, 0], [], []>} : vector<8x8xbf16>, vector<8x8xbf16>, vector<8x8xf32> -> vector<8x8xf32>
    %84 = arith.addf %83, %23 : vector<8x8xf32>
    %cst_39 = arith.constant dense<0xFF800000> : vector<8xf32>
    %85 = vector.multi_reduction <maximumf>, %84, %cst_39 [1] : vector<8x8xf32> to vector<8xf32>
    %86 = vector.shape_cast %85 : vector<8xf32> to vector<8x1xf32>
    %87 = vector.broadcast %86 : vector<8x1xf32> to vector<8x8xf32>
    %88 = arith.subf %84, %87 : vector<8x8xf32>
    %89 = math.exp %88 : vector<8x8xf32>
    %cst_40 = arith.constant dense<0.000000e+00> : vector<8xf32>
    %90 = vector.multi_reduction <add>, %89, %cst_40 [1] : vector<8x8xf32> to vector<8xf32>
    %91 = vector.shape_cast %90 : vector<8xf32> to vector<8x1xf32>
    %92 = tpu.reciprocal %91 {approx = true} : vector<8x1xf32> -> vector<8x1xf32>
    %93 = arith.truncf %89 : vector<8x8xf32> to vector<8x8xbf16>
    %c0_41 = arith.constant 0 : index
    %c24_42 = arith.constant 24 : index
    %94 = vector.load %arg20[%c0_41, %c24_42] : memref<8x32xbf16, #tpu.memory_space<vmem>>, vector<8x8xbf16>
    %cst_43 = arith.constant dense<0.000000e+00> : vector<8x8xf32>
    %95 = tpu.matmul %93, %94, %cst_43 {dimension_numbers = #tpu.dot_dimension_numbers<[1], [0], [0], [1], [0, 0, 1, 1], [], []>} : vector<8x8xbf16>, vector<8x8xbf16>, vector<8x8xf32> -> vector<8x8xf32>
    %96 = vector.broadcast %92 : vector<8x1xf32> to vector<8x8xf32>
    %97 = arith.mulf %95, %96 : vector<8x8xf32>
    %98 = arith.truncf %97 : vector<8x8xf32> to vector<8x8xbf16>
    %c0_44 = arith.constant 0 : index
    %c24_45 = arith.constant 24 : index
    %99 = vector.load %arg21[%c0_44, %c24_45] : memref<8x32xbf16, #tpu.memory_space<vmem>>, vector<8x8xbf16>
    tpu.vector_store %arg21[%c0_44, %c24_45], %98 {strides = array<i32>} : memref<8x32xbf16, #tpu.memory_space<vmem>>, vector<8x8xbf16>,
    %c0_46 = arith.constant 0 : index
    %c0_47 = arith.constant 0 : index
    %100 = vector.load %arg21[%c0_46, %c0_47] : memref<8x32xbf16, #tpu.memory_space<vmem>>, vector<8x32xbf16>
    %c0_48 = arith.constant 0 : index
    %c0_49 = arith.constant 0 : index
    %101 = vector.load %arg9[%c0_48, %c0_49] : memref<32x32xbf16, #tpu.memory_space<vmem>>, vector<32x32xbf16>
    %cst_50 = arith.constant dense<0.000000e+00> : vector<8x32xf32>
    %102 = tpu.matmul %100, %101, %cst_50 {dimension_numbers = #tpu.dot_dimension_numbers<[1], [0], [0], [1], [0, 0, 1, 1], [], []>} : vector<8x32xbf16>, vector<32x32xbf16>, vector<8x32xf32> -> vector<8x32xf32>
    %c0_51 = arith.constant 0 : index
    %c0_52 = arith.constant 0 : index
    %103 = vector.load %arg10[%c0_51, %c0_52] : memref<1x32xf32, #tpu.memory_space<vmem>>, vector<1x32xf32>
    %104 = vector.broadcast %103 : vector<1x32xf32> to vector<8x32xf32>
    %105 = arith.addf %102, %104 : vector<8x32xf32>
    %106 = arith.addf %7, %105 : vector<8x32xf32>
    %c0_53 = arith.constant 0 : index
    %c0_54 = arith.constant 0 : index
    %107 = vector.load %arg11[%c0_53, %c0_54] : memref<1x32xf32, #tpu.memory_space<vmem>>, vector<1x32xf32>
    %c0_55 = arith.constant 0 : index
    %c0_56 = arith.constant 0 : index
    %108 = vector.load %arg12[%c0_55, %c0_56] : memref<1x32xf32, #tpu.memory_space<vmem>>, vector<1x32xf32>
    %cst_57 = arith.constant dense<0.000000e+00> : vector<8xf32>
    %109 = vector.multi_reduction <add>, %106, %cst_57 [1] : vector<8x32xf32> to vector<8xf32>
    %110 = vector.shape_cast %109 : vector<8xf32> to vector<8x1xf32>
    %cst_58 = arith.constant 3.200000e+01 : f32
    %111 = vector.broadcast %cst_58 : f32 to vector<8x1xf32>
    %112 = arith.divf %110, %111 : vector<8x1xf32>
    %113 = vector.broadcast %112 : vector<8x1xf32> to vector<8x32xf32>
    %114 = arith.subf %106, %113 : vector<8x32xf32>
    %115 = arith.mulf %114, %114 : vector<8x32xf32>
    %cst_59 = arith.constant dense<0.000000e+00> : vector<8xf32>
    %116 = vector.multi_reduction <add>, %115, %cst_59 [1] : vector<8x32xf32> to vector<8xf32>
    %117 = vector.shape_cast %116 : vector<8xf32> to vector<8x1xf32>
    %cst_60 = arith.constant 3.200000e+01 : f32
    %118 = vector.broadcast %cst_60 : f32 to vector<8x1xf32>
    %119 = arith.divf %117, %118 : vector<8x1xf32>
    %120 = vector.broadcast %112 : vector<8x1xf32> to vector<8x32xf32>
    %121 = arith.subf %106, %120 : vector<8x32xf32>
    %cst_61 = arith.constant 9.99999974E-6 : f32
    %122 = vector.broadcast %cst_61 : f32 to vector<8x1xf32>
    %123 = arith.addf %119, %122 : vector<8x1xf32>
    %124 = math.rsqrt %123 : vector<8x1xf32>
    %125 = vector.broadcast %124 : vector<8x1xf32> to vector<8x32xf32>
    %126 = arith.mulf %121, %125 : vector<8x32xf32>
    %127 = vector.broadcast %107 : vector<1x32xf32> to vector<8x32xf32>
    %128 = arith.mulf %126, %127 : vector<8x32xf32>
    %129 = vector.broadcast %108 : vector<1x32xf32> to vector<8x32xf32>
    %130 = arith.addf %128, %129 : vector<8x32xf32>
    %131 = arith.truncf %130 : vector<8x32xf32> to vector<8x32xbf16>
    %c0_62 = arith.constant 0 : index
    %c0_63 = arith.constant 0 : index
    %132 = vector.load %arg13[%c0_62, %c0_63] : memref<32x128xbf16, #tpu.memory_space<vmem>>, vector<32x128xbf16>
    %cst_64 = arith.constant dense<0.000000e+00> : vector<8x128xf32>
    %133 = tpu.matmul %131, %132, %cst_64 {dimension_numbers = #tpu.dot_dimension_numbers<[1], [0], [0], [1], [0, 0, 1, 1], [], []>} : vector<8x32xbf16>, vector<32x128xbf16>, vector<8x128xf32> -> vector<8x128xf32>
    %c0_65 = arith.constant 0 : index
    %c0_66 = arith.constant 0 : index
    %134 = vector.load %arg14[%c0_65, %c0_66] : memref<1x128xf32, #tpu.memory_space<vmem>>, vector<1x128xf32>
    %135 = vector.broadcast %134 : vector<1x128xf32> to vector<8x128xf32>
    %136 = arith.addf %133, %135 : vector<8x128xf32>
    %cst_67 = arith.constant 5.000000e-01 : f32
    %137 = vector.broadcast %cst_67 : f32 to vector<8x128xf32>
    %138 = arith.mulf %137, %136 : vector<8x128xf32>
    %cst_68 = arith.constant 0.707106769 : f32
    %139 = vector.broadcast %cst_68 : f32 to vector<8x128xf32>
    %140 = arith.mulf %136, %139 : vector<8x128xf32>
    %141 = math.erf %140 : vector<8x128xf32>
    %cst_69 = arith.constant 1.000000e+00 : f32
    %142 = vector.broadcast %cst_69 : f32 to vector<8x128xf32>
    %143 = arith.addf %142, %141 : vector<8x128xf32>
    %144 = arith.mulf %138, %143 : vector<8x128xf32>
    %145 = arith.truncf %144 : vector<8x128xf32> to vector<8x128xbf16>
    %c0_70 = arith.constant 0 : index
    %c0_71 = arith.constant 0 : index
    %146 = vector.load %arg15[%c0_70, %c0_71] : memref<128x32xbf16, #tpu.memory_space<vmem>>, vector<128x32xbf16>
    %cst_72 = arith.constant dense<0.000000e+00> : vector<8x32xf32>
    %147 = tpu.matmul %145, %146, %cst_72 {dimension_numbers = #tpu.dot_dimension_numbers<[1], [0], [0], [1], [0, 0, 1, 1], [], []>} : vector<8x128xbf16>, vector<128x32xbf16>, vector<8x32xf32> -> vector<8x32xf32>
    %c0_73 = arith.constant 0 : index
    %c0_74 = arith.constant 0 : index
    %148 = vector.load %arg16[%c0_73, %c0_74] : memref<1x32xf32, #tpu.memory_space<vmem>>, vector<1x32xf32>
    %149 = vector.broadcast %148 : vector<1x32xf32> to vector<8x32xf32>
    %150 = arith.addf %147, %149 : vector<8x32xf32>
    %151 = arith.addf %106, %150 : vector<8x32xf32>
    %c0_75 = arith.constant 0 : index
    %c0_76 = arith.constant 0 : index
    %c0_77 = arith.constant 0 : index
    %152 = vector.load %arg17[%c0_75, %c0_76, %c0_77] : memref<1x8x32xf32, #tpu.memory_space<vmem>>, vector<1x8x32xf32>
    %153 = vector.shape_cast %152 : vector<1x8x32xf32> to vector<8x32xf32>
    %154 = vector.shape_cast %151 : vector<8x32xf32> to vector<1x8x32xf32>
    tpu.vector_store %arg17[%c0_75, %c0_76, %c0_77], %154 {strides = array<i32>} : memref<1x8x32xf32, #tpu.memory_space<vmem>>, vector<1x8x32xf32>,
    return
  }
  func.func @transform_0(%arg0: i32, %arg1: i32) -> (i32, i32, i32) {
    %c0_i32 = arith.constant 0 : i32
    %c0_i32_0 = arith.constant 0 : i32
    %c0_i32_1 = arith.constant 0 : i32
    return %arg0, %c0_i32, %c0_i32_0 : i32, i32, i32
  }
  func.func @transform_1(%arg0: i32, %arg1: i32) -> (i32, i32) {
    %c0_i32 = arith.constant 0 : i32
    %c0_i32_0 = arith.constant 0 : i32
    %c0_i32_1 = arith.constant 0 : i32
    return %c0_i32, %c0_i32_0 : i32, i32
  }
  func.func @transform_2(%arg0: i32, %arg1: i32) -> (i32, i32) {
    %c0_i32 = arith.constant 0 : i32
    %c0_i32_0 = arith.constant 0 : i32
    %c0_i32_1 = arith.constant 0 : i32
    return %c0_i32, %c0_i32_0 : i32, i32
  }
  func.func @transform_3(%arg0: i32, %arg1: i32) -> (i32, i32) {
    %c0_i32 = arith.constant 0 : i32
    %c0_i32_0 = arith.constant 0 : i32
    %c0_i32_1 = arith.constant 0 : i32
    return %c0_i32, %c0_i32_0 : i32, i32
  }
  func.func @transform_4(%arg0: i32, %arg1: i32) -> (i32, i32) {
    %c0_i32 = arith.constant 0 : i32
    %c0_i32_0 = arith.constant 0 : i32
    %c0_i32_1 = arith.constant 0 : i32
    return %c0_i32, %c0_i32_0 : i32, i32
  }
  func.func @transform_5(%arg0: i32, %arg1: i32) -> (i32, i32) {
    %c0_i32 = arith.constant 0 : i32
    %c0_i32_0 = arith.constant 0 : i32
    %c0_i32_1 = arith.constant 0 : i32
    return %c0_i32, %c0_i32_0 : i32, i32
  }
  func.func @transform_6(%arg0: i32, %arg1: i32) -> (i32, i32) {
    %c0_i32 = arith.constant 0 : i32
    %c0_i32_0 = arith.constant 0 : i32
    %c0_i32_1 = arith.constant 0 : i32
    return %c0_i32, %c0_i32_0 : i32, i32
  }
  func.func @transform_7(%arg0: i32, %arg1: i32) -> (i32, i32) {
    %c0_i32 = arith.constant 0 : i32
    %c0_i32_0 = arith.constant 0 : i32
    %c0_i32_1 = arith.constant 0 : i32
    return %c0_i32, %c0_i32_0 : i32, i32
  }
  func.func @transform_8(%arg0: i32, %arg1: i32) -> (i32, i32) {
    %c0_i32 = arith.constant 0 : i32
    %c0_i32_0 = arith.constant 0 : i32
    %c0_i32_1 = arith.constant 0 : i32
    return %c0_i32, %c0_i32_0 : i32, i32
  }
  func.func @transform_9(%arg0: i32, %arg1: i32) -> (i32, i32) {
    %c0_i32 = arith.constant 0 : i32
    %c0_i32_0 = arith.constant 0 : i32
    %c0_i32_1 = arith.constant 0 : i32
    return %c0_i32, %c0_i32_0 : i32, i32
  }
  func.func @transform_10(%arg0: i32, %arg1: i32) -> (i32, i32) {
    %c0_i32 = arith.constant 0 : i32
    %c0_i32_0 = arith.constant 0 : i32
    %c0_i32_1 = arith.constant 0 : i32
    return %c0_i32, %c0_i32_0 : i32, i32
  }
  func.func @transform_11(%arg0: i32, %arg1: i32) -> (i32, i32) {
    %c0_i32 = arith.constant 0 : i32
    %c0_i32_0 = arith.constant 0 : i32
    %c0_i32_1 = arith.constant 0 : i32
    return %c0_i32, %c0_i32_0 : i32, i32
  }
  func.func @transform_12(%arg0: i32, %arg1: i32) -> (i32, i32) {
    %c0_i32 = arith.constant 0 : i32
    %c0_i32_0 = arith.constant 0 : i32
    %c0_i32_1 = arith.constant 0 : i32
    return %c0_i32, %c0_i32_0 : i32, i32
  }
  func.func @transform_13(%arg0: i32, %arg1: i32) -> (i32, i32) {
    %c0_i32 = arith.constant 0 : i32
    %c0_i32_0 = arith.constant 0 : i32
    %c0_i32_1 = arith.constant 0 : i32
    return %c0_i32, %c0_i32_0 : i32, i32
  }
  func.func @transform_14(%arg0: i32, %arg1: i32) -> (i32, i32) {
    %c0_i32 = arith.constant 0 : i32
    %c0_i32_0 = arith.constant 0 : i32
    %c0_i32_1 = arith.constant 0 : i32
    return %c0_i32, %c0_i32_0 : i32, i32
  }
  func.func @transform_15(%arg0: i32, %arg1: i32) -> (i32, i32, i32) {
    %c0_i32 = arith.constant 0 : i32
    %c0_i32_0 = arith.constant 0 : i32
    return %arg0, %arg1, %c0_i32 : i32, i32, i32
  }
}

</mosaic_0001>

<bundles_post_ra>
// kernel: tpu_custom_call.1
= control target key start
LH: loop header
LB: loop body
LE: loop exit
PB: predicated region body
PF: predicated region fallthrough
CT: control target
= control target key end

     0   :  { %s2338_s0 = inlined_call_operand.vmem [shape: f32[2,8,32], index: 0, kind: input, shape index: {}]   ;;  %s2339_s1 = inlined_call_operand.vmem [shape: f32[1,32], index: 1, kind: input, shape index: {}]   ;;  %s2340_s2 = inlined_call_operand.vmem [shape: f32[1,32], index: 2, kind: input, shape index: {}]   ;;  %s2341_s3 = inlined_call_operand.vmem [shape: bf16[32,32], index: 3, kind: input, shape index: {}]   ;;  %s2342_s4 = inlined_call_operand.vmem [shape: f32[1,32], index: 4, kind: input, shape index: {}]   ;;  %s2343_s5 = inlined_call_operand.vmem [shape: bf16[32,64], index: 5, kind: input, shape index: {}]   ;;  %s2344_s6 = inlined_call_operand.vmem [shape: f32[1,64], index: 6, kind: input, shape index: {}]   ;;  %s2345_s7 = inlined_call_operand.vmem [shape: bf16[32,32], index: 7, kind: input, shape index: {}]   ;;  %s2346_s8 = inlined_call_operand.vmem [shape: f32[1,32], index: 8, kind: input, shape index: {}]   ;;  %s2347_s9 = inlined_call_operand.vmem [shape: f32[1,32], index: 9, kind: input, shape index: {}]   ;;  %s2348_s10 = inlined_call_operand.vmem [shape: f32[1,32], index: 10, kind: input, shape index: {}]   ;;  %s2349_s11 = inlined_call_operand.vmem [shape: bf16[32,128], index: 11, kind: input, shape index: {}]   ;;  %s2350_s12 = inlined_call_operand.vmem [shape: f32[1,128], index: 12, kind: input, shape index: {}]   ;;  %s2351_s13 = inlined_call_operand.vmem [shape: bf16[128,32], index: 13, kind: input, shape index: {}]   ;;  %s2352_s14 = inlined_call_operand.vmem [shape: f32[1,32], index: 14, kind: input, shape index: {}]   ;;  %s2353_s15 = inlined_call_operand.hbm [shape: f32[2,8,32], index: 15, kind: output, shape index: {}]  }
   0x1   :  { %2356 = sst [smem:[#allocation11_spill]] %s2338_s0 }
   0x2   :  { %2357 = sst [smem:[#allocation12_spill]] %s2339_s1 }
   0x3   :  { %2358 = sst [smem:[#allocation13_spill]] %s2340_s2 }
   0x4   :  { %2359 = sst [smem:[#allocation14_spill]] %s2341_s3 }
   0x5   :  { %20 = vsyncpa [#allocation7], 0 }
   0x6   :  { %22 = vsyncpa [#allocation7 + $0x1], 0  ;;  %s2046_s18 = smov 0   ;;  %s2048_s19 = smov 0  }
   0x7   :  { %s2050_s20 = smov 0   ;;  %s2052_s21 = smov 0  }
   0x8   :  { %s2054_s22 = smov 0   ;;  %s2056_s23 = smov 0  }
   0x9 LB: > { %2360 = sst [smem:[#allocation9_spill]] %s1933_s18  ;;  %s1567_s24 = sadd.s32 4294967295, %s1953_s23   ;;  %s1953_s23 = sphi %s2056_s23, %s28_s23   ;;  %s1949_s22 = sphi %s2054_s22, %s2374_s22   ;;  %s1945_s21 = sphi %s2052_s21, %s2373_s21   ;;  %s1941_s20 = sphi %s2050_s20, %s2372_s20   ;;  %s1937_s19 = sphi %s2048_s19, %s2371_s19   ;;  %s1933_s18 = sphi %s2046_s18, %s2370_s18  }
   0xa   : > { %s1568_s25 = sadd.s32 4294967294, %s1953_s23   ;;  %s40_s26 = sadd.s32 1, %s1949_s22 }
   0xb   : > { %s369_s27 = sadd.s32 1, %s1941_s20  ;;  %p42_p0 = scmp.ge.s32.totalorder %s40_s26, 2 }
   0xc   : > { %p379_p1 = scmp.ne.s32.totalorder %s1941_s20, %s1937_s19  ;;  %p380_p2 = scmp.eq.s32.totalorder %s1567_s24, 1 }
   0xd   : > { %p385_p3 = scmp.ne.s32.totalorder %s1937_s19, %s1933_s18  ;;  %s2376_s26 = smov (%p42_p0, %s40_s26), 0 }
   0xe   : > { %2361 = sst [smem:[#allocation10_spill]] %s2376_s26  ;;  %p2086_p4 = por %p380_p2, %p379_p1 }
   0xf   : > { %p386_p5 = scmp.eq.s32.totalorder %s1568_s25, 1  ;;  %s364_s29 = ssub.s32 %s1949_s22, %s2376_s26 }
  0x10   : > { %p1571_p6 = scmp.ge.s32.totalorder %s1953_s23, 1  ;;  %p367_p7 = scmp.eq.s32.totalorder %s364_s29, 0 }
  0x11   : > { %p2093_p8 = por %p386_p5, %p385_p3  ;;  %p453_p9 = scmp.lt.s32.totalorder %s1953_s23, 3 }
  0x12   : > { %s2099_s16 = scalar_select %p367_p7, %s1941_s20, %s369_s27  }
  0x13   : > { %p454_p10 = pnand %p1571_p6, %p453_p9 }
  0x14   : > { %p500_p11 = scmp.lt.s32.totalorder (!%p454_p10), %s1945_s21, 1  ;;  %vm513_vm0 = vcmask (!%p454_p10), 261120   ;;  %s2364_s0 = sld [smem:[#allocation11_spill]] (!%p454_p10)  ;;  %v1831_v7 = vld [vmem:[%s2343_s5] sm:$0xff] (!%p454_p10)   ;;  %v1955_v8 = vmov (!%p454_p10), 0.0   ;;  %vm1956_vm1 = vmmov (!%p454_p10), 0   ;;  %v695_v54 = vlaneseq (!%p454_p10) }
  0x15   : > { %457 = sbr.rel (%p454_p10) target bundleno = 2420 (0x974), region = 80  ;;  %1666 = vmatprep.subr.bf16.mxu1 (!%p454_p10), %v1955_v8  ;;  %1670 = vmatprep.mubr.msk.bf16.mxu1 (!%p454_p10), %vm1956_vm1, %v1955_v8  ;;  %v1832_v9 = vld [vmem:[%s2343_s5 + $0x8] sm:$0xff] (!%p454_p10)   ;;  %s2365_s1 = sld [smem:[#allocation12_spill]] (!%p454_p10)  ;;  %vm543_vm2 = vcmask (!%p454_p10), 257024   ;;  %v1576_v23 = vld [vmem:[%s2344_s6] ss:$0 sm:$0xff] (!%p454_p10) }
  0x16   : > { %1667 = vmatpush3.bf16.msra.mxu1 (!%p454_p10), %v1831_v7  ;;  %1694 = vmatprep.subr.bf16.mxu0 (!%p454_p10), %v1955_v8  ;;  %s2366_s2 = sld [smem:[#allocation13_spill]] (!%p454_p10)  ;;  %s2367_s3 = sld [smem:[#allocation14_spill]] (!%p454_p10)  ;;  %v1581_v32 = vld [vmem:[%s2342_s4] ss:$0 sm:$0xff] (!%p454_p10)  ;;  %vm704_vm3 = vcmask (!%p454_p10), 64512   ;;  %vm766_vm4 = vcmask (!%p454_p10), 1043456  }
  0x17   : > { %1668 = vmatprep.subr.bf16.mxu1 (!%p454_p10), %v1955_v8  ;;  %1696 = vmatprep.mubr.msk.bf16.mxu0 (!%p454_p10), %vm1956_vm1, %v1955_v8  ;;  %s1957_s18 = smov (!%p454_p10), 112   ;;  %v696_v55 = vshrl.u32 (!%p454_p10), %v695_v54, 7  ;;  %v700_v56 = vand.u32 (!%p454_p10), 127, %v695_v54  ;;  %v1961_v57 = vmov (!%p454_p10), -1e+30   ;;  %vm812_vm6 = vcmask (!%p454_p10), 60416  }
  0x18   : > { %s1962_s25 = smov (!%p454_p10), 8   ;;  %vm940_vm7 = vcmask (!%p454_p10), 126016   ;;  %vm1067_vm8 = vcmask (!%p454_p10), 191616   ;;  %vm1194_vm9 = vcmask (!%p454_p10), 257216  }
  0x19   : > { %vm701_vm5 = vcmp.ge.s32.totalorder (!%p454_p10), %v696_v55, %v700_v56 }
  0x1a   : > { %1669 = vmatpush3.bf16.msra.mxu1 (!%p454_p10), %v1832_v9  ;;  %v702_v58 = vsel (!%p454_p10), %vm701_vm5, 0.0, %v1961_v57 }
  0x1b   : > { %1674 = vmatprep.subr.bf16.mxu1 (!%p454_p10), %v1955_v8  ;;  %v1574_v14 = vld [vmem:[%s2365_s1] ss:$0 sm:$0xff] (!%p454_p10) }
  0x1c   : > { %s501_s17 = scalar_select %p500_p11, %s1945_s21, 1  ;;  %v1575_v16 = vld [vmem:[%s2366_s2] ss:$0 sm:$0xff]  ;;  %v1834_v21 = vld [vmem:[%s2367_s3 + $0x8] sm:$0xff]  }
  0x1d   : > { %v1833_v19 = vld [vmem:[%s2367_s3] sm:$0xff]  }
  0x1e   : > { %s1573_s24 = sshll.u32 %s501_s17, 3  ;;  %s1959_s17 = smov 104  }
  0x1f   : > { %s503_s26 = scalar_lea.vmem %s2364_s0, %s1573_s24  ;;  %s1960_s24 = smov 96  }
  0x20   : > { %v2106_v0 = vld [vmem:[%s503_s26] sm:$0xff]  ;;  %s1958_s26 = smov 120  }
  0x21   : > { %v514_v1 = vsel %vm513_vm0, %v2106_v0, 0.0 }
  0x22   : > { %515 = vadd.xlane.f32.xlu0 %v514_v1 }
  0xaf   : > { %v516_v2 = vpop.xlane.xlu0 %515 }
  0xb0   : > { %v518_v3 = vmul.f32 0.03125, %v516_v2 }
  0xb2   : > { %v519_v4 = vsub.f32 %v2106_v0, %v518_v3 }
  0xb4   : > { %v520_v5 = vmul.f32 %v519_v4, %v519_v4 }
  0xb6   : > { %v521_v6 = vsel %vm513_vm0, %v520_v5, 0.0 }
  0xb7   : > { %522 = vadd.xlane.f32.xlu0 %v521_v6 }
 0x144   : > { %v523_v10 = vpop.xlane.xlu0 %522 }
 0x145   : > { %v524_v11 = vmul.f32 0.03125, %v523_v10 }
 0x147   : > { %v525_v12 = vadd.f32 1e-05, %v524_v11 }
 0x149   : > { %1853 = vrsqrt.f32 %v525_v12 }
 0x153   : > { %v1854_v13 = vpop.eup %1853 }
 0x154   : > { %v527_v15 = vmul.f32 %v1854_v13, %v519_v4 }
 0x156   : > { %v534_v17 = vmul.f32 %v1574_v14, %v527_v15 }
 0x158   : > { %v541_v18 = vadd.f32 %v1575_v16, %v534_v17 }
 0x15a   : > { %v542_v20 = vpack.c.bf16 %v541_v18, %v541_v18 }
 0x15c   : > { %544 = vst.msk [vmem:[#allocation2] sm:$0xf] %vm543_vm2, %v542_v20  ;;  %1671 = vmatmul.mubr.msk.bf16.vlgmr.msra.gmra.mrb[0].mxu1 %vm513_vm0, %v542_v20 }
 0x15d   : > { %1675 = vmatpush3.bf16.msra.mxu1 %v1833_v19  ;;  %1678 = vmatprep.mubr.msk.bf16.mxu1 %vm1956_vm1, %v1955_v8 }
 0x15e   : > { %1676 = vmatprep.subr.bf16.mxu1 %v1955_v8 }
 0x161   : > { %1677 = vmatpush3.bf16.msra.mxu1 %v1834_v21 }
 0x162   : > { %1682 = vmatprep.subr.bf16.mxu1 %v1955_v8 }
 0x163   : > { %v626_v22 = vld [vmem:[#allocation2] sm:$0xf] }
 0x164   : > { %1679 = vmatmul.mubr.msk.bf16.vlgmr.msra.gmra.mrb[4].mxu1 %vm513_vm0, %v626_v22 }
 0x165   : > { %1684 = vmatprep.mubr.msk.bf16.mxu1 %vm1956_vm1, %v1955_v8 }
 0x22f   : > { %v605_v24 = vpop.f32.mrb[0].mxu1 }
 0x230   : > { %v606_v25 = vadd.f32 %v1576_v23, %v605_v24  ;;  %v1672_v26 = vpop.f32.mrb[1].mxu1 }
 0x231   : > { %v608_v27 = vpop.f32.mrb[2].mxu1 }
 0x232   : > { %v611_v28 = vpack.c.bf16 %v606_v25, %v606_v25  ;;  %v1673_v29 = vpop.f32.mrb[3].mxu1 }
 0x234   : > { %612 = vst.msk [vmem:[#allocation3] sm:$0xf] %vm543_vm2, %v611_v28 }
 0x237   : > { %v688_v30 = vpop.f32.mrb[4].mxu1 }
 0x238   : > { %v1680_v31 = vpop.f32.mrb[5].mxu1  ;;  %v689_v37 = vadd.f32 %v1581_v32, %v688_v30 }
 0x239   : > { %v691_v33 = vpop.f32.mrb[6].mxu1 }
 0x23a   : > { %v1681_v34 = vpop.f32.mrb[7].mxu1  ;;  %v694_v40 = vpack.c.bf16 %v689_v37, %v689_v37 }
 0x23b   : > { %v703_v35 = vld [vmem:[#allocation3] sm:$0xf] }
 0x23c   : > { %v1835_v36 = vld [vmem:[#allocation3] ss:$0 sps:$4 sm:$0xff]   ;;  %v709_v38 = vsel %vm704_vm3, %v703_v35, 0 }
 0x23d   : > { %v1836_v39 = vld [vmem:[#allocation3] ss:$0 sps:$4 sm:$0xff]   ;;  %1683 = vmatpush3.bf16.xpose.msra.mxu1 %v709_v38  ;;  %948 = vrot.lane.b32.xlu0 %v1835_v36, %s1957_s18 }
 0x23e   : > { %821 = vrot.lane.b32.xlu1 %v1836_v39, %s1958_s26  ;;  %1688 = vmatprep.subr.bf16.mxu1 %v1955_v8  ;;  %v1837_v41 = vld [vmem:[#allocation3] ss:$0 sps:$4 sm:$0xff]  }
 0x242   : > { %816 = vrot.lane.b32.xlu1 %v694_v40, %s1958_s26 }
 0x244   : > { %1685 = vmatmul.mubr.msk.bf16.vlgmr.msra.gmra.mrb[8].mxu1 %vm704_vm3, %v694_v40 }
 0x245   : > { %1690 = vmatprep.mubr.msk.bf16.mxu1 %vm1956_vm1, %v1955_v8 }
 0x246   : > { %943 = vrot.lane.b32.xlu1 %v694_v40, %s1957_s18 }
 0x24a   : > { %1075 = vrot.lane.b32.xlu1 %v1837_v41, %s1959_s17 }
 0x24e   : > { %1070 = vrot.lane.b32.xlu1 %v694_v40, %s1959_s17 }
 0x252   : > { %616 = vrot.lane.b32.xlu1 %v611_v28, %s1960_s24  ;;  %s1964_s24 = smov 24  }
 0x2af   : > { %v949_v45 = vpop.permute.xlu0 %948 }
 0x2b0   : > { %v822_v42 = vpop.permute.xlu1 %821  ;;  %v954_v47 = vsel %vm704_vm3, %v949_v45, 0 }
 0x2b1   : > { %v827_v43 = vsel %vm704_vm3, %v822_v42, 0 }
 0x2b2   : > { %1695 = vmatpush3.bf16.xpose.msra.mxu0 %v827_v43 }
 0x2b3   : > { %1706 = vmatprep.subr.bf16.mxu0 %v1955_v8 }
 0x2b4   : > { %v817_v44 = vpop.permute.xlu1 %816 }
 0x2b8   : > { %v944_v46 = vpop.permute.xlu1 %943 }
 0x2b9   : > { %1697 = vmatmul.mubr.msk.bf16.vlgmr.msra.gmra.mrb[0].mxu0 %vm704_vm3, %v817_v44 }
 0x2ba   : > { %1707 = vmatpush3.bf16.xpose.msra.mxu0 %v954_v47  ;;  %1708 = vmatprep.mubr.msk.bf16.mxu0 %vm1956_vm1, %v1955_v8 }
 0x2bb   : > { %1718 = vmatprep.subr.bf16.mxu0 %v1955_v8 }
 0x2bc   : > { %v1076_v48 = vpop.permute.xlu1 %1075 }
 0x2bd   : > { %v1081_v50 = vsel %vm704_vm3, %v1076_v48, 0 }
 0x2c0   : > { %v1071_v49 = vpop.permute.xlu1 %1070 }
 0x2c1   : > { %1709 = vmatmul.mubr.msk.bf16.vlgmr.msra.gmra.mrb[4].mxu0 %vm704_vm3, %v944_v46 }
 0x2c2   : > { %1719 = vmatpush3.bf16.xpose.msra.mxu0 %v1081_v50  ;;  %1720 = vmatprep.mubr.msk.bf16.mxu0 %vm1956_vm1, %v1955_v8 }
 0x2c3   : > { %1730 = vmatprep.subr.bf16.mxu0 %v1955_v8 }
 0x2c4   : > { %v617_v51 = vpop.permute.xlu1 %616 }
 0x2c5   : > { %619 = vst.msk [vmem:[#allocation4] sm:$0xf] %vm543_vm2, %v617_v51 }
 0x2c9   : > { %1721 = vmatmul.mubr.msk.bf16.vlgmr.msra.gmra.mrb[8].mxu0 %vm704_vm3, %v1071_v49 }
 0x2ca   : > { %1734 = vmatprep.mubr.msk.bf16.mxu0 %vm1956_vm1, %v1955_v8 }
 0x2cc   : > { %v762_v52 = vld [vmem:[#allocation4] sm:$0xf] }
 0x2cd   : > { %v768_v53 = vsel %vm766_vm4, %v762_v52, 0  ;;  %v1838_v2 = vld [vmem:[#allocation4] ss:$0 sps:$4 sm:$0xff]  }
 0x2ce   : > { %1689 = vmatpush3.bf16.msra.mxu1 %v768_v53  ;;  %v1839_v22 = vld [vmem:[#allocation4] ss:$0 sps:$4 sm:$0xff]  }
 0x2cf   : > { %1700 = vmatprep.subr.bf16.mxu1 %v1955_v8  ;;  %v1840_v26 = vld [vmem:[#allocation4] ss:$0 sps:$4 sm:$0xff]  }
 0x317   : > { %v745_v59 = vpop.f32.mrb[8].mxu1 }
 0x318   : > { %v746_v60 = vadd.f32 %v745_v59, %v702_v58  ;;  %v1686_v61 = vpop.f32.mrb[9].mxu1 }
 0x319   : > { %v748_v62 = vpop.f32.mrb[10].mxu1 }
 0x31a   : > { %v1687_v63 = vpop.f32.mrb[11].mxu1  ;;  %v751_v1 = vsel %vm704_vm3, %v746_v60, -inf }
 0x31b   : > { %752 = vmax.xlane.f32.xlu1 %v751_v1 }
 0x32c   : > { %884 = vrot.lane.b32.xlu1 %v1838_v2, %s1958_s26  ;;  %s497_s26 = sand.u32 1, %s1937_s19  }
 0x32d   : > { %s1572_s0 = sshll.u32 %s497_s26, 3 }
 0x32e   : > { %s499_s27 = scalar_lea.vmem [#allocation6], %s1572_s0 }
 0x32f   : > { %s1495_s29 = sshll.u32 %s499_s27, 4  ;;  %s2292_s29 = int_to_ptr.vmem [resolvable:$true] %s1495_s29 }
 0x330   : > { %s1875_s0 = scalar_lea.vmem %s2292_s29, 128 }
 0x331   : > { %p1876_p12 = scmp.ne.s32.totalorder %s2292_s29, %s1875_s0 }
 0x333   : > { %p1877_p13 = pnand %p1876_p12, %p2086_p4 }
 0x335   : > { %p1878_p0 = pneg %p1877_p13 }
 0x38c   : > { %v863_v3 = vpop.f32.mrb[0].mxu0 }
 0x38d   : > { %v864_v4 = vadd.f32 %v863_v3, %v702_v58  ;;  %v1698_v5 = vpop.f32.mrb[1].mxu0 }
 0x38e   : > { %v866_v6 = vpop.f32.mrb[2].mxu0 }
 0x38f   : > { %v1699_v7 = vpop.f32.mrb[3].mxu0  ;;  %v869_v9 = vsel %vm704_vm3, %v864_v4, -inf }
 0x390   : > { %870 = vmax.xlane.f32.xlu0 %v869_v9 }
 0x394   : > { %v990_v10 = vpop.f32.mrb[4].mxu0 }
 0x395   : > { %v991_v11 = vadd.f32 %v990_v10, %v702_v58  ;;  %v1710_v12 = vpop.f32.mrb[5].mxu0 }
 0x396   : > { %v993_v13 = vpop.f32.mrb[6].mxu0  ;;  %v1841_v12 = vld [vmem:[%s2345_s7] sm:$0xff]  }
 0x397   : > { %v1711_v14 = vpop.f32.mrb[7].mxu0  ;;  %v996_v15 = vsel %vm704_vm3, %v991_v11, -inf  ;;  %1731 = vmatpush3.bf16.msra.mxu0 %v1841_v12 }
 0x398   : > { %997 = vmax.xlane.f32.xlu1 %v996_v15  ;;  %1732 = vmatprep.subr.bf16.mxu0 %v1955_v8 }
 0x39c   : > { %v1117_v16 = vpop.f32.mrb[8].mxu0 }
 0x39d   : > { %v1118_v17 = vadd.f32 %v1117_v16, %v702_v58  ;;  %v1722_v18 = vpop.f32.mrb[9].mxu0  ;;  %v1842_v16 = vld [vmem:[%s2345_s7 + $0x8] sm:$0xff]  }
 0x39e   : > { %v1120_v19 = vpop.f32.mrb[10].mxu0  ;;  %1733 = vmatpush3.bf16.msra.mxu0 %v1842_v16 }
 0x39f   : > { %v1723_v20 = vpop.f32.mrb[11].mxu0  ;;  %v1123_v21 = vsel %vm704_vm3, %v1118_v17, -inf  ;;  %1746 = vmatprep.subr.bf16.mxu0 %v1955_v8 }
 0x3a0   : > { %1124 = vmax.xlane.f32.xlu0 %v1123_v21 }
 0x3a8   : > { %v753_v23 = vpop.xlane.xlu1 %752 }
 0x3a9   : > { %v754_v24 = vsub.f32 %v746_v60, %v753_v23  ;;  %1138 = vrot.lane.b32.xlu1 %v1839_v22, %s1959_s17  ;;  %s1963_s17 = smov 16  }
 0x3ab   : > { %v755_v25 = vmul.f32 1.442695, %v754_v24 }
 0x3ac   : > { %v885_v28 = vpop.permute.xlu1 %884 }
 0x3ad   : > { %1855 = vpow2.f32 %v755_v25  ;;  %v890_v30 = vsel %vm766_vm4, %v885_v28, 0 }
 0x3b6   : > { %1011 = vrot.lane.b32.xlu0 %v1840_v26, %s1957_s18 }
 0x3b7   : > { %v1856_v27 = vpop.eup %1855 }
 0x3b8   : > { %v761_v29 = vpack.c.bf16 %v1856_v27, %v1856_v27  ;;  %v757_v44 = vsel %vm704_vm3, %v1856_v27, 0.0 }
 0x3ba   : > { %1691 = vmatmul.mubr.msk.bf16.vlgmr.msra.gmra.mrb[12].mxu1 %vm704_vm3, %v761_v29 }
 0x3bb   : > { %1701 = vmatpush3.bf16.msra.mxu1 %v890_v30  ;;  %1702 = vmatprep.mubr.msk.bf16.mxu1 %vm1956_vm1, %v1955_v8  ;;  %v1602_v30 = vld [vmem:[%s2346_s8] ss:$0 sm:$0xff] }
 0x3bc   : > { %1712 = vmatprep.subr.bf16.mxu1 %v1955_v8 }
 0x41d   : > { %v871_v31 = vpop.xlane.xlu0 %870 }
 0x41e   : > { %v872_v32 = vsub.f32 %v864_v4, %v871_v31 }
 0x420   : > { %v873_v33 = vmul.f32 1.442695, %v872_v32 }
 0x422   : > { %1857 = vpow2.f32 %v873_v33 }
 0x425   : > { %v998_v34 = vpop.xlane.xlu1 %997 }
 0x426   : > { %v999_v35 = vsub.f32 %v991_v11, %v998_v34 }
 0x428   : > { %v1000_v36 = vmul.f32 1.442695, %v999_v35 }
 0x429   : > { %v1139_v47 = vpop.permute.xlu1 %1138 }
 0x42a   : > { %1859 = vpow2.f32 %v1000_v36  ;;  %v1144_v50 = vsel %vm766_vm4, %v1139_v47, 0 }
 0x42c   : > { %v1858_v37 = vpop.eup %1857 }
 0x42d   : > { %v1125_v38 = vpop.xlane.xlu0 %1124  ;;  %v875_v39 = vsel %vm704_vm3, %v1858_v37, 0.0  ;;  %v879_v40 = vpack.c.bf16 %v1858_v37, %v1858_v37 }
 0x42e   : > { %v1126_v41 = vsub.f32 %v1118_v17, %v1125_v38  ;;  %876 = vadd.xlane.f32.xlu1 %v875_v39 }
 0x42f   : > { %1703 = vmatmul.mubr.msk.bf16.vlgmr.msra.gmra.mrb[16].mxu1 %vm704_vm3, %v879_v40 }
 0x430   : > { %v1127_v42 = vmul.f32 1.442695, %v1126_v41  ;;  %1714 = vmatprep.mubr.msk.bf16.mxu1 %vm1956_vm1, %v1955_v8 }
 0x431   : > { %v1012_v43 = vpop.permute.xlu0 %1011 }
 0x432   : > { %1861 = vpow2.f32 %v1127_v42  ;;  %v1017_v45 = vsel %vm766_vm4, %v1012_v43, 0  ;;  %758 = vadd.xlane.f32.xlu1 %v757_v44  ;;  %v1843_v43 = vld [vmem:[%s2349_s11] sm:$0xff]  }
 0x433   : > { %1713 = vmatpush3.bf16.msra.mxu1 %v1017_v45  ;;  %v1845_v44 = vld [vmem:[%s2351_s13] sm:$0xff]   ;;  %v1846_v45 = vld [vmem:[%s2351_s13 + $0x8] sm:$0xff]  }
 0x434   : > { %v1860_v46 = vpop.eup %1859  ;;  %1724 = vmatprep.subr.bf16.mxu1 %v1955_v8 }
 0x435   : > { %v1002_v48 = vsel %vm704_vm3, %v1860_v46, 0.0  ;;  %v1006_v49 = vpack.c.bf16 %v1860_v46, %v1860_v46  ;;  %v1847_v46 = vld [vmem:[%s2351_s13 + $0x10] sm:$0xff]  }
 0x436   : > { %1003 = vadd.xlane.f32.xlu0 %v1002_v48 }
 0x437   : > { %1715 = vmatmul.mubr.msk.bf16.vlgmr.msra.gmra.mrb[20].mxu1 %vm704_vm3, %v1006_v49 }
 0x438   : > { %1725 = vmatpush3.bf16.msra.mxu1 %v1144_v50  ;;  %1726 = vmatprep.mubr.msk.bf16.mxu1 %vm1956_vm1, %v1955_v8 }
 0x439   : > { %1738 = vmatprep.subr.bf16.mxu1 %v1955_v8 }
 0x43c   : > { %v1862_v51 = vpop.eup %1861 }
 0x43d   : > { %v1129_v52 = vsel %vm704_vm3, %v1862_v51, 0.0  ;;  %v1133_v53 = vpack.c.bf16 %v1862_v51, %v1862_v51  ;;  %v1606_v51 = vld [vmem:[%s2347_s9] ss:$0 sm:$0xff] }
 0x43e   : > { %1130 = vadd.xlane.f32.xlu0 %v1129_v52 }
 0x43f   : > { %1727 = vmatmul.mubr.msk.bf16.vlgmr.msra.gmra.mrb[24].mxu1 %vm704_vm3, %v1133_v53  ;;  %v1607_v53 = vld [vmem:[%s2348_s10] ss:$0 sm:$0xff] }
 0x440   : > { %1742 = vmatprep.mubr.msk.bf16.mxu1 %vm1956_vm1, %v1955_v8  ;;  %1739 = vmatpush3.bf16.msra.mxu1 %v1843_v43 }
 0x441   : > { %1740 = vmatprep.subr.bf16.mxu1 %v1955_v8 }
 0x48d   : > { %v804_v54 = vpop.f32.mrb[12].mxu1 }
 0x48e   : > { %v1692_v55 = vpop.f32.mrb[13].mxu1 }
 0x48f   : > { %v807_v56 = vpop.f32.mrb[14].mxu1 }
 0x490   : > { %v1693_v57 = vpop.f32.mrb[15].mxu1 }
 0x491   : > { %v1848_v57 = vld [vmem:[%s2351_s13 + $0x18] sm:$0xff]  }
 0x4bb   : > { %v877_v58 = vpop.xlane.xlu1 %876 }
 0x4bf   : > { %v759_v59 = vpop.xlane.xlu1 %758 }
 0x4c0   : > { %1863 = vrcp.f32 %v759_v59  ;;  %v1850_v59 = vld [vmem:[%s2351_s13 + $0x28] sm:$0xff]  }
 0x4c1   : > { %1865 = vrcp.f32 %v877_v58  ;;  %v1849_v58 = vld [vmem:[%s2351_s13 + $0x20] sm:$0xff]  }
 0x4c3   : > { %v1004_v63 = vpop.xlane.xlu0 %1003 }
 0x4c4   : > { %1867 = vrcp.f32 %v1004_v63 }
 0x4ca   : > { %v1864_v60 = vpop.eup %1863 }
 0x4cb   : > { %v810_v61 = vmul.f32 %v1864_v60, %v804_v54  ;;  %v1866_v1 = vpop.eup %1865  ;;  %v1131_v6 = vpop.xlane.xlu0 %1130  ;;  %v1851_v60 = vld [vmem:[%s2351_s13 + $0x30] sm:$0xff]  }
 0x4cc   : > { %1869 = vrcp.f32 %v1131_v6 }
 0x4cd   : > { %v811_v62 = vpack.c.bf16 %v810_v61, %v810_v61  ;;  %v1852_v61 = vld [vmem:[%s2351_s13 + $0x38] sm:$0xff]  }
 0x4ce   : > { %v1868_v10 = vpop.eup %1867 }
 0x4cf   : > { %813 = vst.msk [vmem:[#allocation5] sm:$0xf] %vm812_vm6, %v811_v62  ;;  %v1608_v62 = vld [vmem:[%s2350_s12] ss:$0 sm:$0xff] }
 0x4d6   : > { %v1870_v19 = vpop.eup %1869 }
 0x502   : > { %v926_v2 = vpop.f32.mrb[16].mxu1 }
 0x503   : > { %v932_v3 = vmul.f32 %v1866_v1, %v926_v2  ;;  %v1704_v4 = vpop.f32.mrb[17].mxu1 }
 0x504   : > { %v929_v5 = vpop.f32.mrb[18].mxu1 }
 0x505   : > { %v1626_v7 = vpack.c.bf16 %v932_v3, %v932_v3  ;;  %v1705_v9 = vpop.f32.mrb[19].mxu1 }
 0x507   : > { %937 = vrot.lane.b32.xlu0 %v1626_v7, %s1962_s25  ;;  %s1622_s25 = sshll.u32 %s1945_s21, 7  ;;  %s1481_s21 = scalar_lea.sflag [#allocation7], %s497_s26 }
 0x508   : > { %s2290_s2 = scalar_lea.hbm %s2353_s15, %s1622_s25 }
 0x50a   : > { %v1053_v11 = vpop.f32.mrb[20].mxu1 }
 0x50b   : > { %v1059_v13 = vmul.f32 %v1868_v10, %v1053_v11  ;;  %v1716_v14 = vpop.f32.mrb[21].mxu1  ;;  %v1612_v11 = vld [vmem:[%s2352_s14] ss:$0 sm:$0xff] }
 0x50c   : > { %v1056_v15 = vpop.f32.mrb[22].mxu1 }
 0x50d   : > { %v1627_v17 = vpack.c.bf16 %v1059_v13, %v1059_v13  ;;  %v1717_v18 = vpop.f32.mrb[23].mxu1 }
 0x50f   : > { %1064 = vrot.lane.b32.xlu1 %v1627_v17, %s1963_s17  ;;  %s1965_s17 = smov [#allocation6]  }
 0x512   : > { %v1180_v20 = vpop.f32.mrb[24].mxu1 }
 0x513   : > { %v1186_v21 = vmul.f32 %v1870_v19, %v1180_v20  ;;  %v1728_v22 = vpop.f32.mrb[25].mxu1 }
 0x514   : > { %v1183_v23 = vpop.f32.mrb[26].mxu1 }
 0x515   : > { %v1628_v24 = vpack.c.bf16 %v1186_v21, %v1186_v21  ;;  %v1729_v25 = vpop.f32.mrb[27].mxu1 }
 0x517   : > { %1191 = vrot.lane.b32.xlu1 %v1628_v24, %s1964_s24  ;;  %s1879_s24 = sshll.u32 %s1965_s17, 4  ;;  %s1880_s24 = int_to_ptr.vmem [resolvable:$false] %s1879_s24 }
 0x518   : > { %s1881_s3 = scalar_lea.vmem %s1880_s24, 256  ;;  %p1882_p1 = scmp.lt.s32.totalorder %s2292_s29, %s1880_s24 }
 0x519   : > { %p1883_p2 = scmp.lt.s32.totalorder %s1881_s3, %s1875_s0 }
 0x51b   : > { %p1884_p3 = por %p1883_p2, %p1882_p1 }
 0x51d   : > { %p1885_p5 = pnand %p1884_p3, %p1878_p0 }
 0x579   : > { %v938_v26 = vpop.permute.xlu0 %937 }
 0x57a   : > { %941 = vst.msk [vmem:[#allocation5] sm:$0xf] %vm940_vm7, %v938_v26 }
 0x581   : > { %v1065_v27 = vpop.permute.xlu1 %1064 }
 0x582   : > { %1068 = vst.msk [vmem:[#allocation5] sm:$0xf] %vm1067_vm8, %v1065_v27 }
 0x589   : > { %v1192_v28 = vpop.permute.xlu1 %1191 }
 0x58a   : > { %1195 = vst.msk [vmem:[#allocation5] sm:$0xf] %vm1194_vm9, %v1192_v28 }
 0x591   : > { %v1196_v29 = vld [vmem:[#allocation5] sm:$0xf] }
 0x592   : > { %1735 = vmatmul.mubr.msk.bf16.vlgmr.msra.gmra.mrb[12].mxu0 %vm513_vm0, %v1196_v29 }
 0x593   : > { %1762 = vmatprep.mubr.msk.bf16.mxu0 %vm1956_vm1, %v1955_v8  ;;  %1747 = vmatpush3.bf16.msra.mxu0 %v1845_v44 }
 0x594   : > { %1748 = vmatprep.subr.bf16.mxu0 %v1955_v8 }
 0x597   : > { %1749 = vmatpush3.bf16.msra.mxu0 %v1846_v45 }
 0x598   : > { %1750 = vmatprep.subr.bf16.mxu0 %v1955_v8 }
 0x59b   : > { %1751 = vmatpush3.bf16.msra.mxu0 %v1847_v46 }
 0x59c   : > { %1752 = vmatprep.subr.bf16.mxu0 %v1955_v8 }
 0x59f   : > { %1753 = vmatpush3.bf16.msra.mxu0 %v1848_v57 }
 0x5a0   : > { %1754 = vmatprep.subr.bf16.mxu0 %v1955_v8 }
 0x5a3   : > { %1755 = vmatpush3.bf16.msra.mxu0 %v1849_v58 }
 0x5a4   : > { %1756 = vmatprep.subr.bf16.mxu0 %v1955_v8 }
 0x5a7   : > { %1757 = vmatpush3.bf16.msra.mxu0 %v1850_v59 }
 0x5a8   : > { %1758 = vmatprep.subr.bf16.mxu0 %v1955_v8 }
 0x5ab   : > { %1759 = vmatpush3.bf16.msra.mxu0 %v1851_v60 }
 0x5ac   : > { %1760 = vmatprep.subr.bf16.mxu0 %v1955_v8 }
 0x5af   : > { %1761 = vmatpush3.bf16.msra.mxu0 %v1852_v61 }
 0x665   : > { %v1257_v31 = vpop.f32.mrb[12].mxu0 }
 0x666   : > { %v1258_v32 = vadd.f32 %v1602_v30, %v1257_v31  ;;  %v1736_v33 = vpop.f32.mrb[13].mxu0 }
 0x667   : > { %v1260_v34 = vpop.f32.mrb[14].mxu0 }
 0x668   : > { %v2227_v35 = vadd.f32 %v1258_v32, %v2106_v0  ;;  %v1737_v36 = vpop.f32.mrb[15].mxu0  ;;  %v1844_v0 = vld [vmem:[%s2349_s11 + $0x8] sm:$0xff]  }
 0x669   : > { %1741 = vmatpush3.bf16.msra.mxu1 %v1844_v0 }
 0x66a   : > { %v1266_v37 = vsel %vm513_vm0, %v2227_v35, 0.0 }
 0x66b   : > { %1267 = vadd.xlane.f32.xlu0 %v1266_v37 }
 0x6f8   : > { %v1268_v38 = vpop.xlane.xlu0 %1267 }
 0x6f9   : > { %v1270_v39 = vmul.f32 0.03125, %v1268_v38 }
 0x6fb   : > { %v1271_v40 = vsub.f32 %v2227_v35, %v1270_v39 }
 0x6fd   : > { %v1272_v41 = vmul.f32 %v1271_v40, %v1271_v40 }
 0x6ff   : > { %v1273_v42 = vsel %vm513_vm0, %v1272_v41, 0.0 }
 0x700   : > { %1274 = vadd.xlane.f32.xlu1 %v1273_v42 }
 0x78d   : > { %v1275_v47 = vpop.xlane.xlu1 %1274 }
 0x78e   : > { %v1276_v48 = vmul.f32 0.03125, %v1275_v47 }
 0x790   : > { %v1277_v49 = vadd.f32 1e-05, %v1276_v48 }
 0x792   : > { %1871 = vrsqrt.f32 %v1277_v49 }
 0x79c   : > { %v1872_v50 = vpop.eup %1871 }
 0x79d   : > { %v1279_v52 = vmul.f32 %v1872_v50, %v1271_v40 }
 0x79f   : > { %v1286_v54 = vmul.f32 %v1606_v51, %v1279_v52 }
 0x7a1   : > { %v1293_v55 = vadd.f32 %v1607_v53, %v1286_v54 }
 0x7a3   : > { %v1294_v56 = vpack.c.bf16 %v1293_v55, %v1293_v55 }
 0x7a5   : > { %1743 = vmatmul.mubr.msk.bf16.vlgmr.msra.gmra.mrb[28].mxu1 %vm513_vm0, %v1294_v56 }
 0x878   : > { %v1355_v63 = vpop.f32.mrb[28].mxu1 }
 0x879   : > { %v1356_v1 = vadd.f32 %v1608_v62, %v1355_v63  ;;  %v1744_v2 = vpop.f32.mrb[29].mxu1 }
 0x87a   : > { %v1358_v3 = vpop.f32.mrb[30].mxu1 }
 0x87b   : > { %v1362_v4 = vmul.f32 0.70710677, %v1356_v1  ;;  %v1745_v5 = vpop.f32.mrb[31].mxu1  ;;  %v1361_v8 = vmul.f32 0.5, %v1356_v1 }
 0x87d   : > { %1873 = verf.f32 %v1362_v4 }
 0x887   : > { %v1874_v6 = vpop.eup %1873 }
 0x888   : > { %v1364_v7 = vadd.f32 1.0, %v1874_v6 }
 0x88a   : > { %v1365_v9 = vmul.f32 %v1364_v7, %v1361_v8 }
 0x88c   : > { %v1366_v10 = vpack.c.bf16 %v1365_v9, %v1365_v9 }
 0x88e   : > { %1763 = vmatmul.mubr.bf16.vlgmr.msra.gmra.mrb[16].mxu0 %v1366_v10 }
 0x961   : > { %v1472_v12 = vpop.f32.mrb[16].mxu0 }
 0x962   : > { %v1473_v13 = vadd.f32 %v1612_v11, %v1472_v12  ;;  %v1764_v14 = vpop.f32.mrb[17].mxu0 }
 0x963   : > { %v1475_v15 = vpop.f32.mrb[18].mxu0 }
 0x964   : > { %v1478_v16 = vadd.f32 %v1473_v13, %v2227_v35  ;;  %v1765_v17 = vpop.f32.mrb[19].mxu0 }
 0x966   : > { %1479 = vst.msk [vmem:[%s499_s27] sm:$0xff] %vm513_vm0, %v1478_v16 }
 0x967   : > { %1888 = shalt.err (!%p1885_p5)
}
 0x968   : > { %s1889_s1 = scalar_lea.hbm %s2290_s2, 128  ;;  %s1893_s27 = scalar_lea.hbm %s2353_s15, 256 }
 0x969   : > { %p1890_p6 = scmp.ne.s32.totalorder %s2290_s2, %s1889_s1  ;;  %p1894_p10 = scmp.lt.u32.totalorder %s2290_s2, %s2353_s15 }
 0x96a   : > { %p1895_p11 = scmp.lt.u32.totalorder %s1893_s27, %s1889_s1  ;;  %p1897_p13 = scmp.lt.u32.totalorder %s1889_s1, %s2290_s2 }
 0x96b   : > { %p1891_p7 = pnand %p1890_p6, %p2086_p4 }
 0x96c   : > { %p1896_p12 = por %p1895_p11, %p1894_p10 }
 0x96d   : > { %p1892_p9 = pneg %p1891_p7 }
 0x96e   : > { %p1898_p0 = por %p1897_p13, %p1896_p12 }
 0x970   : > { %p1899_p1 = pnand %p1898_p0, %p1892_p9 }
 0x972   : > { %1902 = shalt.err (!%p1899_p1)
}
 0x973   : > { %1766 = dma.vmem_to_hbm [thread:$0]  (%p2086_p4), %s2292_s29, 128, %s2290_s2, %s1481_s21  }
 0x974 PF: > { %s2368_s3 = sld [smem:[#allocation9_spill]]  ;;  %p1772_p2 = scmp.ge.s32.totalorder %s1953_s23, 2 }
 0x976   : > { %p1769_p3 = pnand %p1772_p2, %p2093_p8 }
 0x97a   : > { %s1507_s0 = sand.u32 1, %s2368_s3  }
 0x97b   : > { %s1508_s24 = scalar_lea.sflag [#allocation7], %s1507_s0 }
 0x97c   : > { %1928 = dma.done.wait (!%p1769_p3), %s1508_s24, 128  }
 0x97d   : > { %1930 = vsyncadd (!%p1769_p3), %s1508_s24, 4294967168  ;;  %s28_s23 = sadd.s32 1, %s1953_s23   ;;  %s2369_s28 = sld [smem:[#allocation10_spill]] }
 0x97e   : > { %p25_p5 = scmp.ge.s32.totalorder %s28_s23, 4   ;;  %s2370_s18 = smov %s1937_s19 }
 0x97f   : > { %s2371_s19 = smov %s1941_s20  ;;  %s2372_s20 = smov %s2099_s16 }
 0x980   : > { %s2373_s21 = smov %s1949_s22  ;;  %27 = sbr.rel (!%p25_p5) target bundleno = 9 (0x9), region = 121 }
 0x983   : > { %s2374_s22 = smov %s2369_s28 }
 0x987   :  { %1513 = vsyncpa [#allocation7], 1 }
 0x988   :  { %1515 = vsyncpa [#allocation7 + $0x1], 1 }

// kernel: tpu_custom_call.1
= control target key start
LH: loop header
LB: loop body
LE: loop exit
PB: predicated region body
PF: predicated region fallthrough
CT: control target
= control target key end

     0   :  { %s2338_s0 = inlined_call_operand.vmem [shape: f32[2,8,32], index: 0, kind: input, shape index: {}]   ;;  %s2339_s1 = inlined_call_operand.vmem [shape: f32[1,32], index: 1, kind: input, shape index: {}]   ;;  %s2340_s2 = inlined_call_operand.vmem [shape: f32[1,32], index: 2, kind: input, shape index: {}]   ;;  %s2341_s3 = inlined_call_operand.vmem [shape: bf16[32,32], index: 3, kind: input, shape index: {}]   ;;  %s2342_s4 = inlined_call_operand.vmem [shape: f32[1,32], index: 4, kind: input, shape index: {}]   ;;  %s2343_s5 = inlined_call_operand.vmem [shape: bf16[32,64], index: 5, kind: input, shape index: {}]   ;;  %s2344_s6 = inlined_call_operand.vmem [shape: f32[1,64], index: 6, kind: input, shape index: {}]   ;;  %s2345_s7 = inlined_call_operand.vmem [shape: bf16[32,32], index: 7, kind: input, shape index: {}]   ;;  %s2346_s8 = inlined_call_operand.vmem [shape: f32[1,32], index: 8, kind: input, shape index: {}]   ;;  %s2347_s9 = inlined_call_operand.vmem [shape: f32[1,32], index: 9, kind: input, shape index: {}]   ;;  %s2348_s10 = inlined_call_operand.vmem [shape: f32[1,32], index: 10, kind: input, shape index: {}]   ;;  %s2349_s11 = inlined_call_operand.vmem [shape: bf16[32,128], index: 11, kind: input, shape index: {}]   ;;  %s2350_s12 = inlined_call_operand.vmem [shape: f32[1,128], index: 12, kind: input, shape index: {}]   ;;  %s2351_s13 = inlined_call_operand.vmem [shape: bf16[128,32], index: 13, kind: input, shape index: {}]   ;;  %s2352_s14 = inlined_call_operand.vmem [shape: f32[1,32], index: 14, kind: input, shape index: {}]   ;;  %s2353_s15 = inlined_call_operand.hbm [shape: f32[2,8,32], index: 15, kind: output, shape index: {}]  }
   0x1   :  { %2356 = sst [smem:[#allocation11_spill]] %s2338_s0 }
   0x2   :  { %2357 = sst [smem:[#allocation12_spill]] %s2339_s1 }
   0x3   :  { %2358 = sst [smem:[#allocation13_spill]] %s2340_s2 }
   0x4   :  { %2359 = sst [smem:[#allocation14_spill]] %s2341_s3 }
   0x5   :  { %20 = vsyncpa [#allocation7], 0 }
   0x6   :  { %22 = vsyncpa [#allocation7 + $0x1], 0  ;;  %s2046_s18 = smov 0   ;;  %s2048_s19 = smov 0  }
   0x7   :  { %s2050_s20 = smov 0   ;;  %s2052_s21 = smov 0  }
   0x8   :  { %s2054_s22 = smov 0   ;;  %s2056_s23 = smov 0  }
   0x9 LB: > { %2360 = sst [smem:[#allocation9_spill]] %s1933_s18  ;;  %s1567_s24 = sadd.s32 4294967295, %s1953_s23   ;;  %s1953_s23 = sphi %s2056_s23, %s28_s23   ;;  %s1949_s22 = sphi %s2054_s22, %s2374_s22   ;;  %s1945_s21 = sphi %s2052_s21, %s2373_s21   ;;  %s1941_s20 = sphi %s2050_s20, %s2372_s20   ;;  %s1937_s19 = sphi %s2048_s19, %s2371_s19   ;;  %s1933_s18 = sphi %s2046_s18, %s2370_s18  }
   0xa   : > { %s1568_s25 = sadd.s32 4294967294, %s1953_s23   ;;  %s40_s26 = sadd.s32 1, %s1949_s22 }
   0xb   : > { %s369_s27 = sadd.s32 1, %s1941_s20  ;;  %p42_p0 = scmp.ge.s32.totalorder %s40_s26, 2 }
   0xc   : > { %p379_p1 = scmp.ne.s32.totalorder %s1941_s20, %s1937_s19  ;;  %p380_p2 = scmp.eq.s32.totalorder %s1567_s24, 1 }
   0xd   : > { %p385_p3 = scmp.ne.s32.totalorder %s1937_s19, %s1933_s18  ;;  %s2376_s26 = smov (%p42_p0, %s40_s26), 0 }
   0xe   : > { %2361 = sst [smem:[#allocation10_spill]] %s2376_s26  ;;  %p2086_p4 = por %p380_p2, %p379_p1 }
   0xf   : > { %p386_p5 = scmp.eq.s32.totalorder %s1568_s25, 1  ;;  %s364_s29 = ssub.s32 %s1949_s22, %s2376_s26 }
  0x10   : > { %p1571_p6 = scmp.ge.s32.totalorder %s1953_s23, 1  ;;  %p367_p7 = scmp.eq.s32.totalorder %s364_s29, 0 }
  0x11   : > { %p2093_p8 = por %p386_p5, %p385_p3  ;;  %p453_p9 = scmp.lt.s32.totalorder %s1953_s23, 3 }
  0x12   : > { %s2099_s16 = scalar_select %p367_p7, %s1941_s20, %s369_s27  }
  0x13   : > { %p454_p10 = pnand %p1571_p6, %p453_p9 }
  0x14   : > { %p500_p11 = scmp.lt.s32.totalorder (!%p454_p10), %s1945_s21, 1  ;;  %vm513_vm0 = vcmask (!%p454_p10), 261120   ;;  %s2364_s0 = sld [smem:[#allocation11_spill]] (!%p454_p10)  ;;  %v1831_v7 = vld [vmem:[%s2343_s5] sm:$0xff] (!%p454_p10)   ;;  %v1955_v8 = vmov (!%p454_p10), 0.0   ;;  %vm1956_vm1 = vmmov (!%p454_p10), 0   ;;  %v695_v54 = vlaneseq (!%p454_p10) }
  0x15   : > { %457 = sbr.rel (%p454_p10) target bundleno = 2420 (0x974), region = 80  ;;  %1666 = vmatprep.subr.bf16.mxu1 (!%p454_p10), %v1955_v8  ;;  %1670 = vmatprep.mubr.msk.bf16.mxu1 (!%p454_p10), %vm1956_vm1, %v1955_v8  ;;  %v1832_v9 = vld [vmem:[%s2343_s5 + $0x8] sm:$0xff] (!%p454_p10)   ;;  %s2365_s1 = sld [smem:[#allocation12_spill]] (!%p454_p10)  ;;  %vm543_vm2 = vcmask (!%p454_p10), 257024   ;;  %v1576_v23 = vld [vmem:[%s2344_s6] ss:$0 sm:$0xff] (!%p454_p10) }
  0x16   : > { %1667 = vmatpush3.bf16.msra.mxu1 (!%p454_p10), %v1831_v7  ;;  %1694 = vmatprep.subr.bf16.mxu0 (!%p454_p10), %v1955_v8  ;;  %s2366_s2 = sld [smem:[#allocation13_spill]] (!%p454_p10)  ;;  %s2367_s3 = sld [smem:[#allocation14_spill]] (!%p454_p10)  ;;  %v1581_v32 = vld [vmem:[%s2342_s4] ss:$0 sm:$0xff] (!%p454_p10)  ;;  %vm704_vm3 = vcmask (!%p454_p10), 64512   ;;  %vm766_vm4 = vcmask (!%p454_p10), 1043456  }
  0x17   : > { %1668 = vmatprep.subr.bf16.mxu1 (!%p454_p10), %v1955_v8  ;;  %1696 = vmatprep.mubr.msk.bf16.mxu0 (!%p454_p10), %vm1956_vm1, %v1955_v8  ;;  %s1957_s18 = smov (!%p454_p10), 112   ;;  %v696_v55 = vshrl.u32 (!%p454_p10), %v695_v54, 7  ;;  %v700_v56 = vand.u32 (!%p454_p10), 127, %v695_v54  ;;  %v1961_v57 = vmov (!%p454_p10), -1e+30   ;;  %vm812_vm6 = vcmask (!%p454_p10), 60416  }
  0x18   : > { %s1962_s25 = smov (!%p454_p10), 8   ;;  %vm940_vm7 = vcmask (!%p454_p10), 126016   ;;  %vm1067_vm8 = vcmask (!%p454_p10), 191616   ;;  %vm1194_vm9 = vcmask (!%p454_p10), 257216  }
  0x19   : > { %vm701_vm5 = vcmp.ge.s32.totalorder (!%p454_p10), %v696_v55, %v700_v56 }
  0x1a   : > { %1669 = vmatpush3.bf16.msra.mxu1 (!%p454_p10), %v1832_v9  ;;  %v702_v58 = vsel (!%p454_p10), %vm701_vm5, 0.0, %v1961_v57 }
  0x1b   : > { %1674 = vmatprep.subr.bf16.mxu1 (!%p454_p10), %v1955_v8  ;;  %v1574_v14 = vld [vmem:[%s2365_s1] ss:$0 sm:$0xff] (!%p454_p10) }
  0x1c   : > { %s501_s17 = scalar_select %p500_p11, %s1945_s21, 1  ;;  %v1575_v16 = vld [vmem:[%s2366_s2] ss:$0 sm:$0xff]  ;;  %v1834_v21 = vld [vmem:[%s2367_s3 + $0x8] sm:$0xff]  }
  0x1d   : > { %v1833_v19 = vld [vmem:[%s2367_s3] sm:$0xff]  }
  0x1e   : > { %s1573_s24 = sshll.u32 %s501_s17, 3  ;;  %s1959_s17 = smov 104  }
  0x1f   : > { %s503_s26 = scalar_lea.vmem %s2364_s0, %s1573_s24  ;;  %s1960_s24 = smov 96  }
  0x20   : > { %v2106_v0 = vld [vmem:[%s503_s26] sm:$0xff]  ;;  %s1958_s26 = smov 120  }
  0x21   : > { %v514_v1 = vsel %vm513_vm0, %v2106_v0, 0.0 }
  0x22   : > { %515 = vadd.xlane.f32.xlu0 %v514_v1 }
  0xaf   : > { %v516_v2 = vpop.xlane.xlu0 %515 }
  0xb0   : > { %v518_v3 = vmul.f32 0.03125, %v516_v2 }
  0xb2   : > { %v519_v4 = vsub.f32 %v2106_v0, %v518_v3 }
  0xb4   : > { %v520_v5 = vmul.f32 %v519_v4, %v519_v4 }
  0xb6   : > { %v521_v6 = vsel %vm513_vm0, %v520_v5, 0.0 }
  0xb7   : > { %522 = vadd.xlane.f32.xlu0 %v521_v6 }
 0x144   : > { %v523_v10 = vpop.xlane.xlu0 %522 }
 0x145   : > { %v524_v11 = vmul.f32 0.03125, %v523_v10 }
 0x147   : > { %v525_v12 = vadd.f32 1e-05, %v524_v11 }
 0x149   : > { %1853 = vrsqrt.f32 %v525_v12 }
 0x153   : > { %v1854_v13 = vpop.eup %1853 }
 0x154   : > { %v527_v15 = vmul.f32 %v1854_v13, %v519_v4 }
 0x156   : > { %v534_v17 = vmul.f32 %v1574_v14, %v527_v15 }
 0x158   : > { %v541_v18 = vadd.f32 %v1575_v16, %v534_v17 }
 0x15a   : > { %v542_v20 = vpack.c.bf16 %v541_v18, %v541_v18 }
 0x15c   : > { %544 = vst.msk [vmem:[#allocation2] sm:$0xf] %vm543_vm2, %v542_v20  ;;  %1671 = vmatmul.mubr.msk.bf16.vlgmr.msra.gmra.mrb[0].mxu1 %vm513_vm0, %v542_v20 }
 0x15d   : > { %1675 = vmatpush3.bf16.msra.mxu1 %v1833_v19  ;;  %1678 = vmatprep.mubr.msk.bf16.mxu1 %vm1956_vm1, %v1955_v8 }
 0x15e   : > { %1676 = vmatprep.subr.bf16.mxu1 %v1955_v8 }
 0x161   : > { %1677 = vmatpush3.bf16.msra.mxu1 %v1834_v21 }
 0x162   : > { %1682 = vmatprep.subr.bf16.mxu1 %v1955_v8 }
 0x163   : > { %v626_v22 = vld [vmem:[#allocation2] sm:$0xf] }
 0x164   : > { %1679 = vmatmul.mubr.msk.bf16.vlgmr.msra.gmra.mrb[4].mxu1 %vm513_vm0, %v626_v22 }
 0x165   : > { %1684 = vmatprep.mubr.msk.bf16.mxu1 %vm1956_vm1, %v1955_v8 }
 0x22f   : > { %v605_v24 = vpop.f32.mrb[0].mxu1 }
 0x230   : > { %v606_v25 = vadd.f32 %v1576_v23, %v605_v24  ;;  %v1672_v26 = vpop.f32.mrb[1].mxu1 }
 0x231   : > { %v608_v27 = vpop.f32.mrb[2].mxu1 }
 0x232   : > { %v611_v28 = vpack.c.bf16 %v606_v25, %v606_v25  ;;  %v1673_v29 = vpop.f32.mrb[3].mxu1 }
 0x234   : > { %612 = vst.msk [vmem:[#allocation3] sm:$0xf] %vm543_vm2, %v611_v28 }
 0x237   : > { %v688_v30 = vpop.f32.mrb[4].mxu1 }
 0x238   : > { %v1680_v31 = vpop.f32.mrb[5].mxu1  ;;  %v689_v37 = vadd.f32 %v1581_v32, %v688_v30 }
 0x239   : > { %v691_v33 = vpop.f32.mrb[6].mxu1 }
 0x23a   : > { %v1681_v34 = vpop.f32.mrb[7].mxu1  ;;  %v694_v40 = vpack.c.bf16 %v689_v37, %v689_v37 }
 0x23b   : > { %v703_v35 = vld [vmem:[#allocation3] sm:$0xf] }
 0x23c   : > { %v1835_v36 = vld [vmem:[#allocation3] ss:$0 sps:$4 sm:$0xff]   ;;  %v709_v38 = vsel %vm704_vm3, %v703_v35, 0 }
 0x23d   : > { %v1836_v39 = vld [vmem:[#allocation3] ss:$0 sps:$4 sm:$0xff]   ;;  %1683 = vmatpush3.bf16.xpose.msra.mxu1 %v709_v38  ;;  %948 = vrot.lane.b32.xlu0 %v1835_v36, %s1957_s18 }
 0x23e   : > { %821 = vrot.lane.b32.xlu1 %v1836_v39, %s1958_s26  ;;  %1688 = vmatprep.subr.bf16.mxu1 %v1955_v8  ;;  %v1837_v41 = vld [vmem:[#allocation3] ss:$0 sps:$4 sm:$0xff]  }
 0x242   : > { %816 = vrot.lane.b32.xlu1 %v694_v40, %s1958_s26 }
 0x244   : > { %1685 = vmatmul.mubr.msk.bf16.vlgmr.msra.gmra.mrb[8].mxu1 %vm704_vm3, %v694_v40 }
 0x245   : > { %1690 = vmatprep.mubr.msk.bf16.mxu1 %vm1956_vm1, %v1955_v8 }
 0x246   : > { %943 = vrot.lane.b32.xlu1 %v694_v40, %s1957_s18 }
 0x24a   : > { %1075 = vrot.lane.b32.xlu1 %v1837_v41, %s1959_s17 }
 0x24e   : > { %1070 = vrot.lane.b32.xlu1 %v694_v40, %s1959_s17 }
 0x252   : > { %616 = vrot.lane.b32.xlu1 %v611_v28, %s1960_s24  ;;  %s1964_s24 = smov 24  }
 0x2af   : > { %v949_v45 = vpop.permute.xlu0 %948 }
 0x2b0   : > { %v822_v42 = vpop.permute.xlu1 %821  ;;  %v954_v47 = vsel %vm704_vm3, %v949_v45, 0 }
 0x2b1   : > { %v827_v43 = vsel %vm704_vm3, %v822_v42, 0 }
 0x2b2   : > { %1695 = vmatpush3.bf16.xpose.msra.mxu0 %v827_v43 }
 0x2b3   : > { %1706 = vmatprep.subr.bf16.mxu0 %v1955_v8 }
 0x2b4   : > { %v817_v44 = vpop.permute.xlu1 %816 }
 0x2b8   : > { %v944_v46 = vpop.permute.xlu1 %943 }
 0x2b9   : > { %1697 = vmatmul.mubr.msk.bf16.vlgmr.msra.gmra.mrb[0].mxu0 %vm704_vm3, %v817_v44 }
 0x2ba   : > { %1707 = vmatpush3.bf16.xpose.msra.mxu0 %v954_v47  ;;  %1708 = vmatprep.mubr.msk.bf16.mxu0 %vm1956_vm1, %v1955_v8 }
 0x2bb   : > { %1718 = vmatprep.subr.bf16.mxu0 %v1955_v8 }
 0x2bc   : > { %v1076_v48 = vpop.permute.xlu1 %1075 }
 0x2bd   : > { %v1081_v50 = vsel %vm704_vm3, %v1076_v48, 0 }
 0x2c0   : > { %v1071_v49 = vpop.permute.xlu1 %1070 }
 0x2c1   : > { %1709 = vmatmul.mubr.msk.bf16.vlgmr.msra.gmra.mrb[4].mxu0 %vm704_vm3, %v944_v46 }
 0x2c2   : > { %1719 = vmatpush3.bf16.xpose.msra.mxu0 %v1081_v50  ;;  %1720 = vmatprep.mubr.msk.bf16.mxu0 %vm1956_vm1, %v1955_v8 }
 0x2c3   : > { %1730 = vmatprep.subr.bf16.mxu0 %v1955_v8 }
 0x2c4   : > { %v617_v51 = vpop.permute.xlu1 %616 }
 0x2c5   : > { %619 = vst.msk [vmem:[#allocation4] sm:$0xf] %vm543_vm2, %v617_v51 }
 0x2c9   : > { %1721 = vmatmul.mubr.msk.bf16.vlgmr.msra.gmra.mrb[8].mxu0 %vm704_vm3, %v1071_v49 }
 0x2ca   : > { %1734 = vmatprep.mubr.msk.bf16.mxu0 %vm1956_vm1, %v1955_v8 }
 0x2cc   : > { %v762_v52 = vld [vmem:[#allocation4] sm:$0xf] }
 0x2cd   : > { %v768_v53 = vsel %vm766_vm4, %v762_v52, 0  ;;  %v1838_v2 = vld [vmem:[#allocation4] ss:$0 sps:$4 sm:$0xff]  }
 0x2ce   : > { %1689 = vmatpush3.bf16.msra.mxu1 %v768_v53  ;;  %v1839_v22 = vld [vmem:[#allocation4] ss:$0 sps:$4 sm:$0xff]  }
 0x2cf   : > { %1700 = vmatprep.subr.bf16.mxu1 %v1955_v8  ;;  %v1840_v26 = vld [vmem:[#allocation4] ss:$0 sps:$4 sm:$0xff]  }
 0x317   : > { %v745_v59 = vpop.f32.mrb[8].mxu1 }
 0x318   : > { %v746_v60 = vadd.f32 %v745_v59, %v702_v58  ;;  %v1686_v61 = vpop.f32.mrb[9].mxu1 }
 0x319   : > { %v748_v62 = vpop.f32.mrb[10].mxu1 }
 0x31a   : > { %v1687_v63 = vpop.f32.mrb[11].mxu1  ;;  %v751_v1 = vsel %vm704_vm3, %v746_v60, -inf }
 0x31b   : > { %752 = vmax.xlane.f32.xlu1 %v751_v1 }
 0x32c   : > { %884 = vrot.lane.b32.xlu1 %v1838_v2, %s1958_s26  ;;  %s497_s26 = sand.u32 1, %s1937_s19  }
 0x32d   : > { %s1572_s0 = sshll.u32 %s497_s26, 3 }
 0x32e   : > { %s499_s27 = scalar_lea.vmem [#allocation6], %s1572_s0 }
 0x32f   : > { %s1495_s29 = sshll.u32 %s499_s27, 4  ;;  %s2292_s29 = int_to_ptr.vmem [resolvable:$true] %s1495_s29 }
 0x330   : > { %s1875_s0 = scalar_lea.vmem %s2292_s29, 128 }
 0x331   : > { %p1876_p12 = scmp.ne.s32.totalorder %s2292_s29, %s1875_s0 }
 0x333   : > { %p1877_p13 = pnand %p1876_p12, %p2086_p4 }
 0x335   : > { %p1878_p0 = pneg %p1877_p13 }
 0x38c   : > { %v863_v3 = vpop.f32.mrb[0].mxu0 }
 0x38d   : > { %v864_v4 = vadd.f32 %v863_v3, %v702_v58  ;;  %v1698_v5 = vpop.f32.mrb[1].mxu0 }
 0x38e   : > { %v866_v6 = vpop.f32.mrb[2].mxu0 }
 0x38f   : > { %v1699_v7 = vpop.f32.mrb[3].mxu0  ;;  %v869_v9 = vsel %vm704_vm3, %v864_v4, -inf }
 0x390   : > { %870 = vmax.xlane.f32.xlu0 %v869_v9 }
 0x394   : > { %v990_v10 = vpop.f32.mrb[4].mxu0 }
 0x395   : > { %v991_v11 = vadd.f32 %v990_v10, %v702_v58  ;;  %v1710_v12 = vpop.f32.mrb[5].mxu0 }
 0x396   : > { %v993_v13 = vpop.f32.mrb[6].mxu0  ;;  %v1841_v12 = vld [vmem:[%s2345_s7] sm:$0xff]  }
 0x397   : > { %v1711_v14 = vpop.f32.mrb[7].mxu0  ;;  %v996_v15 = vsel %vm704_vm3, %v991_v11, -inf  ;;  %1731 = vmatpush3.bf16.msra.mxu0 %v1841_v12 }
 0x398   : > { %997 = vmax.xlane.f32.xlu1 %v996_v15  ;;  %1732 = vmatprep.subr.bf16.mxu0 %v1955_v8 }
 0x39c   : > { %v1117_v16 = vpop.f32.mrb[8].mxu0 }
 0x39d   : > { %v1118_v17 = vadd.f32 %v1117_v16, %v702_v58  ;;  %v1722_v18 = vpop.f32.mrb[9].mxu0  ;;  %v1842_v16 = vld [vmem:[%s2345_s7 + $0x8] sm:$0xff]  }
 0x39e   : > { %v1120_v19 = vpop.f32.mrb[10].mxu0  ;;  %1733 = vmatpush3.bf16.msra.mxu0 %v1842_v16 }
 0x39f   : > { %v1723_v20 = vpop.f32.mrb[11].mxu0  ;;  %v1123_v21 = vsel %vm704_vm3, %v1118_v17, -inf  ;;  %1746 = vmatprep.subr.bf16.mxu0 %v1955_v8 }
 0x3a0   : > { %1124 = vmax.xlane.f32.xlu0 %v1123_v21 }
 0x3a8   : > { %v753_v23 = vpop.xlane.xlu1 %752 }
 0x3a9   : > { %v754_v24 = vsub.f32 %v746_v60, %v753_v23  ;;  %1138 = vrot.lane.b32.xlu1 %v1839_v22, %s1959_s17  ;;  %s1963_s17 = smov 16  }
 0x3ab   : > { %v755_v25 = vmul.f32 1.442695, %v754_v24 }
 0x3ac   : > { %v885_v28 = vpop.permute.xlu1 %884 }
 0x3ad   : > { %1855 = vpow2.f32 %v755_v25  ;;  %v890_v30 = vsel %vm766_vm4, %v885_v28, 0 }
 0x3b6   : > { %1011 = vrot.lane.b32.xlu0 %v1840_v26, %s1957_s18 }
 0x3b7   : > { %v1856_v27 = vpop.eup %1855 }
 0x3b8   : > { %v761_v29 = vpack.c.bf16 %v1856_v27, %v1856_v27  ;;  %v757_v44 = vsel %vm704_vm3, %v1856_v27, 0.0 }
 0x3ba   : > { %1691 = vmatmul.mubr.msk.bf16.vlgmr.msra.gmra.mrb[12].mxu1 %vm704_vm3, %v761_v29 }
 0x3bb   : > { %1701 = vmatpush3.bf16.msra.mxu1 %v890_v30  ;;  %1702 = vmatprep.mubr.msk.bf16.mxu1 %vm1956_vm1, %v1955_v8  ;;  %v1602_v30 = vld [vmem:[%s2346_s8] ss:$0 sm:$0xff] }
 0x3bc   : > { %1712 = vmatprep.subr.bf16.mxu1 %v1955_v8 }
 0x41d   : > { %v871_v31 = vpop.xlane.xlu0 %870 }
 0x41e   : > { %v872_v32 = vsub.f32 %v864_v4, %v871_v31 }
 0x420   : > { %v873_v33 = vmul.f32 1.442695, %v872_v32 }
 0x422   : > { %1857 = vpow2.f32 %v873_v33 }
 0x425   : > { %v998_v34 = vpop.xlane.xlu1 %997 }
 0x426   : > { %v999_v35 = vsub.f32 %v991_v11, %v998_v34 }
 0x428   : > { %v1000_v36 = vmul.f32 1.442695, %v999_v35 }
 0x429   : > { %v1139_v47 = vpop.permute.xlu1 %1138 }
 0x42a   : > { %1859 = vpow2.f32 %v1000_v36  ;;  %v1144_v50 = vsel %vm766_vm4, %v1139_v47, 0 }
 0x42c   : > { %v1858_v37 = vpop.eup %1857 }
 0x42d   : > { %v1125_v38 = vpop.xlane.xlu0 %1124  ;;  %v875_v39 = vsel %vm704_vm3, %v1858_v37, 0.0  ;;  %v879_v40 = vpack.c.bf16 %v1858_v37, %v1858_v37 }
 0x42e   : > { %v1126_v41 = vsub.f32 %v1118_v17, %v1125_v38  ;;  %876 = vadd.xlane.f32.xlu1 %v875_v39 }
 0x42f   : > { %1703 = vmatmul.mubr.msk.bf16.vlgmr.msra.gmra.mrb[16].mxu1 %vm704_vm3, %v879_v40 }
 0x430   : > { %v1127_v42 = vmul.f32 1.442695, %v1126_v41  ;;  %1714 = vmatprep.mubr.msk.bf16.mxu1 %vm1956_vm1, %v1955_v8 }
 0x431   : > { %v1012_v43 = vpop.permute.xlu0 %1011 }
 0x432   : > { %1861 = vpow2.f32 %v1127_v42  ;;  %v1017_v45 = vsel %vm766_vm4, %v1012_v43, 0  ;;  %758 = vadd.xlane.f32.xlu1 %v757_v44  ;;  %v1843_v43 = vld [vmem:[%s2349_s11] sm:$0xff]  }
 0x433   : > { %1713 = vmatpush3.bf16.msra.mxu1 %v1017_v45  ;;  %v1845_v44 = vld [vmem:[%s2351_s13] sm:$0xff]   ;;  %v1846_v45 = vld [vmem:[%s2351_s13 + $0x8] sm:$0xff]  }
 0x434   : > { %v1860_v46 = vpop.eup %1859  ;;  %1724 = vmatprep.subr.bf16.mxu1 %v1955_v8 }
 0x435   : > { %v1002_v48 = vsel %vm704_vm3, %v1860_v46, 0.0  ;;  %v1006_v49 = vpack.c.bf16 %v1860_v46, %v1860_v46  ;;  %v1847_v46 = vld [vmem:[%s2351_s13 + $0x10] sm:$0xff]  }
 0x436   : > { %1003 = vadd.xlane.f32.xlu0 %v1002_v48 }
 0x437   : > { %1715 = vmatmul.mubr.msk.bf16.vlgmr.msra.gmra.mrb[20].mxu1 %vm704_vm3, %v1006_v49 }
 0x438   : > { %1725 = vmatpush3.bf16.msra.mxu1 %v1144_v50  ;;  %1726 = vmatprep.mubr.msk.bf16.mxu1 %vm1956_vm1, %v1955_v8 }
 0x439   : > { %1738 = vmatprep.subr.bf16.mxu1 %v1955_v8 }
 0x43c   : > { %v1862_v51 = vpop.eup %1861 }
 0x43d   : > { %v1129_v52 = vsel %vm704_vm3, %v1862_v51, 0.0  ;;  %v1133_v53 = vpack.c.bf16 %v1862_v51, %v1862_v51  ;;  %v1606_v51 = vld [vmem:[%s2347_s9] ss:$0 sm:$0xff] }
 0x43e   : > { %1130 = vadd.xlane.f32.xlu0 %v1129_v52 }
 0x43f   : > { %1727 = vmatmul.mubr.msk.bf16.vlgmr.msra.gmra.mrb[24].mxu1 %vm704_vm3, %v1133_v53  ;;  %v1607_v53 = vld [vmem:[%s2348_s10] ss:$0 sm:$0xff] }
 0x440   : > { %1742 = vmatprep.mubr.msk.bf16.mxu1 %vm1956_vm1, %v1955_v8  ;;  %1739 = vmatpush3.bf16.msra.mxu1 %v1843_v43 }
 0x441   : > { %1740 = vmatprep.subr.bf16.mxu1 %v1955_v8 }
 0x48d   : > { %v804_v54 = vpop.f32.mrb[12].mxu1 }
 0x48e   : > { %v1692_v55 = vpop.f32.mrb[13].mxu1 }
 0x48f   : > { %v807_v56 = vpop.f32.mrb[14].mxu1 }
 0x490   : > { %v1693_v57 = vpop.f32.mrb[15].mxu1 }
 0x491   : > { %v1848_v57 = vld [vmem:[%s2351_s13 + $0x18] sm:$0xff]  }
 0x4bb   : > { %v877_v58 = vpop.xlane.xlu1 %876 }
 0x4bf   : > { %v759_v59 = vpop.xlane.xlu1 %758 }
 0x4c0   : > { %1863 = vrcp.f32 %v759_v59  ;;  %v1850_v59 = vld [vmem:[%s2351_s13 + $0x28] sm:$0xff]  }
 0x4c1   : > { %1865 = vrcp.f32 %v877_v58  ;;  %v1849_v58 = vld [vmem:[%s2351_s13 + $0x20] sm:$0xff]  }
 0x4c3   : > { %v1004_v63 = vpop.xlane.xlu0 %1003 }
 0x4c4   : > { %1867 = vrcp.f32 %v1004_v63 }
 0x4ca   : > { %v1864_v60 = vpop.eup %1863 }
 0x4cb   : > { %v810_v61 = vmul.f32 %v1864_v60, %v804_v54  ;;  %v1866_v1 = vpop.eup %1865  ;;  %v1131_v6 = vpop.xlane.xlu0 %1130  ;;  %v1851_v60 = vld [vmem:[%s2351_s13 + $0x30] sm:$0xff]  }
 0x4cc   : > { %1869 = vrcp.f32 %v1131_v6 }
 0x4cd   : > { %v811_v62 = vpack.c.bf16 %v810_v61, %v810_v61  ;;  %v1852_v61 = vld [vmem:[%s2351_s13 + $0x38] sm:$0xff]  }
 0x4ce   : > { %v1868_v10 = vpop.eup %1867 }
 0x4cf   : > { %813 = vst.msk [vmem:[#allocation5] sm:$0xf] %vm812_vm6, %v811_v62  ;;  %v1608_v62 = vld [vmem:[%s2350_s12] ss:$0 sm:$0xff] }
 0x4d6   : > { %v1870_v19 = vpop.eup %1869 }
 0x502   : > { %v926_v2 = vpop.f32.mrb[16].mxu1 }
 0x503   : > { %v932_v3 = vmul.f32 %v1866_v1, %v926_v2  ;;  %v1704_v4 = vpop.f32.mrb[17].mxu1 }
 0x504   : > { %v929_v5 = vpop.f32.mrb[18].mxu1 }
 0x505   : > { %v1626_v7 = vpack.c.bf16 %v932_v3, %v932_v3  ;;  %v1705_v9 = vpop.f32.mrb[19].mxu1 }
 0x507   : > { %937 = vrot.lane.b32.xlu0 %v1626_v7, %s1962_s25  ;;  %s1622_s25 = sshll.u32 %s1945_s21, 7  ;;  %s1481_s21 = scalar_lea.sflag [#allocation7], %s497_s26 }
 0x508   : > { %s2290_s2 = scalar_lea.hbm %s2353_s15, %s1622_s25 }
 0x50a   : > { %v1053_v11 = vpop.f32.mrb[20].mxu1 }
 0x50b   : > { %v1059_v13 = vmul.f32 %v1868_v10, %v1053_v11  ;;  %v1716_v14 = vpop.f32.mrb[21].mxu1  ;;  %v1612_v11 = vld [vmem:[%s2352_s14] ss:$0 sm:$0xff] }
 0x50c   : > { %v1056_v15 = vpop.f32.mrb[22].mxu1 }
 0x50d   : > { %v1627_v17 = vpack.c.bf16 %v1059_v13, %v1059_v13  ;;  %v1717_v18 = vpop.f32.mrb[23].mxu1 }
 0x50f   : > { %1064 = vrot.lane.b32.xlu1 %v1627_v17, %s1963_s17  ;;  %s1965_s17 = smov [#allocation6]  }
 0x512   : > { %v1180_v20 = vpop.f32.mrb[24].mxu1 }
 0x513   : > { %v1186_v21 = vmul.f32 %v1870_v19, %v1180_v20  ;;  %v1728_v22 = vpop.f32.mrb[25].mxu1 }
 0x514   : > { %v1183_v23 = vpop.f32.mrb[26].mxu1 }
 0x515   : > { %v1628_v24 = vpack.c.bf16 %v1186_v21, %v1186_v21  ;;  %v1729_v25 = vpop.f32.mrb[27].mxu1 }
 0x517   : > { %1191 = vrot.lane.b32.xlu1 %v1628_v24, %s1964_s24  ;;  %s1879_s24 = sshll.u32 %s1965_s17, 4  ;;  %s1880_s24 = int_to_ptr.vmem [resolvable:$false] %s1879_s24 }
 0x518   : > { %s1881_s3 = scalar_lea.vmem %s1880_s24, 256  ;;  %p1882_p1 = scmp.lt.s32.totalorder %s2292_s29, %s1880_s24 }
 0x519   : > { %p1883_p2 = scmp.lt.s32.totalorder %s1881_s3, %s1875_s0 }
 0x51b   : > { %p1884_p3 = por %p1883_p2, %p1882_p1 }
 0x51d   : > { %p1885_p5 = pnand %p1884_p3, %p1878_p0 }
 0x579   : > { %v938_v26 = vpop.permute.xlu0 %937 }
 0x57a   : > { %941 = vst.msk [vmem:[#allocation5] sm:$0xf] %vm940_vm7, %v938_v26 }
 0x581   : > { %v1065_v27 = vpop.permute.xlu1 %1064 }
 0x582   : > { %1068 = vst.msk [vmem:[#allocation5] sm:$0xf] %vm1067_vm8, %v1065_v27 }
 0x589   : > { %v1192_v28 = vpop.permute.xlu1 %1191 }
 0x58a   : > { %1195 = vst.msk [vmem:[#allocation5] sm:$0xf] %vm1194_vm9, %v1192_v28 }
 0x591   : > { %v1196_v29 = vld [vmem:[#allocation5] sm:$0xf] }
 0x592   : > { %1735 = vmatmul.mubr.msk.bf16.vlgmr.msra.gmra.mrb[12].mxu0 %vm513_vm0, %v1196_v29 }
 0x593   : > { %1762 = vmatprep.mubr.msk.bf16.mxu0 %vm1956_vm1, %v1955_v8  ;;  %1747 = vmatpush3.bf16.msra.mxu0 %v1845_v44 }
 0x594   : > { %1748 = vmatprep.subr.bf16.mxu0 %v1955_v8 }
 0x597   : > { %1749 = vmatpush3.bf16.msra.mxu0 %v1846_v45 }
 0x598   : > { %1750 = vmatprep.subr.bf16.mxu0 %v1955_v8 }
 0x59b   : > { %1751 = vmatpush3.bf16.msra.mxu0 %v1847_v46 }
 0x59c   : > { %1752 = vmatprep.subr.bf16.mxu0 %v1955_v8 }
 0x59f   : > { %1753 = vmatpush3.bf16.msra.mxu0 %v1848_v57 }
 0x5a0   : > { %1754 = vmatprep.subr.bf16.mxu0 %v1955_v8 }
 0x5a3   : > { %1755 = vmatpush3.bf16.msra.mxu0 %v1849_v58 }
 0x5a4   : > { %1756 = vmatprep.subr.bf16.mxu0 %v1955_v8 }
 0x5a7   : > { %1757 = vmatpush3.bf16.msra.mxu0 %v1850_v59 }
 0x5a8   : > { %1758 = vmatprep.subr.bf16.mxu0 %v1955_v8 }
 0x5ab   : > { %1759 = vmatpush3.bf16.msra.mxu0 %v1851_v60 }
 0x5ac   : > { %1760 = vmatprep.subr.bf16.mxu0 %v1955_v8 }
 0x5af   : > { %1761 = vmatpush3.bf16.msra.mxu0 %v1852_v61 }
 0x665   : > { %v1257_v31 = vpop.f32.mrb[12].mxu0 }
 0x666   : > { %v1258_v32 = vadd.f32 %v1602_v30, %v1257_v31  ;;  %v1736_v33 = vpop.f32.mrb[13].mxu0 }
 0x667   : > { %v1260_v34 = vpop.f32.mrb[14].mxu0 }
 0x668   : > { %v2227_v35 = vadd.f32 %v1258_v32, %v2106_v0  ;;  %v1737_v36 = vpop.f32.mrb[15].mxu0  ;;  %v1844_v0 = vld [vmem:[%s2349_s11 + $0x8] sm:$0xff]  }
 0x669   : > { %1741 = vmatpush3.bf16.msra.mxu1 %v1844_v0 }
 0x66a   : > { %v1266_v37 = vsel %vm513_vm0, %v2227_v35, 0.0 }
 0x66b   : > { %1267 = vadd.xlane.f32.xlu0 %v1266_v37 }
 0x6f8   : > { %v1268_v38 = vpop.xlane.xlu0 %1267 }
 0x6f9   : > { %v1270_v39 = vmul.f32 0.03125, %v1268_v38 }
 0x6fb   : > { %v1271_v40 = vsub.f32 %v2227_v35, %v1270_v39 }
 0x6fd   : > { %v1272_v41 = vmul.f32 %v1271_v40, %v1271_v40 }
 0x6ff   : > { %v1273_v42 = vsel %vm513_vm0, %v1272_v41, 0.0 }
 0x700   : > { %1274 = vadd.xlane.f32.xlu1 %v1273_v42 }
 0x78d   : > { %v1275_v47 = vpop.xlane.xlu1 %1274 }
 0x78e   : > { %v1276_v48 = vmul.f32 0.03125, %v1275_v47 }
 0x790   : > { %v1277_v49 = vadd.f32 1e-05, %v1276_v48 }
 0x792   : > { %1871 = vrsqrt.f32 %v1277_v49 }
 0x79c   : > { %v1872_v50 = vpop.eup %1871 }
 0x79d   : > { %v1279_v52 = vmul.f32 %v1872_v50, %v1271_v40 }
 0x79f   : > { %v1286_v54 = vmul.f32 %v1606_v51, %v1279_v52 }
 0x7a1   : > { %v1293_v55 = vadd.f32 %v1607_v53, %v1286_v54 }
 0x7a3   : > { %v1294_v56 = vpack.c.bf16 %v1293_v55, %v1293_v55 }
 0x7a5   : > { %1743 = vmatmul.mubr.msk.bf16.vlgmr.msra.gmra.mrb[28].mxu1 %vm513_vm0, %v1294_v56 }
 0x878   : > { %v1355_v63 = vpop.f32.mrb[28].mxu1 }
 0x879   : > { %v1356_v1 = vadd.f32 %v1608_v62, %v1355_v63  ;;  %v1744_v2 = vpop.f32.mrb[29].mxu1 }
 0x87a   : > { %v1358_v3 = vpop.f32.mrb[30].mxu1 }
 0x87b   : > { %v1362_v4 = vmul.f32 0.70710677, %v1356_v1  ;;  %v1745_v5 = vpop.f32.mrb[31].mxu1  ;;  %v1361_v8 = vmul.f32 0.5, %v1356_v1 }
 0x87d   : > { %1873 = verf.f32 %v1362_v4 }
 0x887   : > { %v1874_v6 = vpop.eup %1873 }
 0x888   : > { %v1364_v7 = vadd.f32 1.0, %v1874_v6 }
 0x88a   : > { %v1365_v9 = vmul.f32 %v1364_v7, %v1361_v8 }
 0x88c   : > { %v1366_v10 = vpack.c.bf16 %v1365_v9, %v1365_v9 }
 0x88e   : > { %1763 = vmatmul.mubr.bf16.vlgmr.msra.gmra.mrb[16].mxu0 %v1366_v10 }
 0x961   : > { %v1472_v12 = vpop.f32.mrb[16].mxu0 }
 0x962   : > { %v1473_v13 = vadd.f32 %v1612_v11, %v1472_v12  ;;  %v1764_v14 = vpop.f32.mrb[17].mxu0 }
 0x963   : > { %v1475_v15 = vpop.f32.mrb[18].mxu0 }
 0x964   : > { %v1478_v16 = vadd.f32 %v1473_v13, %v2227_v35  ;;  %v1765_v17 = vpop.f32.mrb[19].mxu0 }
 0x966   : > { %1479 = vst.msk [vmem:[%s499_s27] sm:$0xff] %vm513_vm0, %v1478_v16 }
 0x967   : > { %1888 = shalt.err (!%p1885_p5)
}
 0x968   : > { %s1889_s1 = scalar_lea.hbm %s2290_s2, 128  ;;  %s1893_s27 = scalar_lea.hbm %s2353_s15, 256 }
 0x969   : > { %p1890_p6 = scmp.ne.s32.totalorder %s2290_s2, %s1889_s1  ;;  %p1894_p10 = scmp.lt.u32.totalorder %s2290_s2, %s2353_s15 }
 0x96a   : > { %p1895_p11 = scmp.lt.u32.totalorder %s1893_s27, %s1889_s1  ;;  %p1897_p13 = scmp.lt.u32.totalorder %s1889_s1, %s2290_s2 }
 0x96b   : > { %p1891_p7 = pnand %p1890_p6, %p2086_p4 }
 0x96c   : > { %p1896_p12 = por %p1895_p11, %p1894_p10 }
 0x96d   : > { %p1892_p9 = pneg %p1891_p7 }
 0x96e   : > { %p1898_p0 = por %p1897_p13, %p1896_p12 }
 0x970   : > { %p1899_p1 = pnand %p1898_p0, %p1892_p9 }
 0x972   : > { %1902 = shalt.err (!%p1899_p1)
}
 0x973   : > { %1766 = dma.vmem_to_hbm [thread:$0]  (%p2086_p4), %s2292_s29, 128, %s2290_s2, %s1481_s21  }
 0x974 PF: > { %s2368_s3 = sld [smem:[#allocation9_spill]]  ;;  %p1772_p2 = scmp.ge.s32.totalorder %s1953_s23, 2 }
 0x976   : > { %p1769_p3 = pnand %p1772_p2, %p2093_p8 }
 0x97a   : > { %s1507_s0 = sand.u32 1, %s2368_s3  }
 0x97b   : > { %s1508_s24 = scalar_lea.sflag [#allocation7], %s1507_s0 }
 0x97c   : > { %1928 = dma.done.wait (!%p1769_p3), %s1508_s24, 128  }
 0x97d   : > { %1930 = vsyncadd (!%p1769_p3), %s1508_s24, 4294967168  ;;  %s28_s23 = sadd.s32 1, %s1953_s23   ;;  %s2369_s28 = sld [smem:[#allocation10_spill]] }
 0x97e   : > { %p25_p5 = scmp.ge.s32.totalorder %s28_s23, 4   ;;  %s2370_s18 = smov %s1937_s19 }
 0x97f   : > { %s2371_s19 = smov %s1941_s20  ;;  %s2372_s20 = smov %s2099_s16 }
 0x980   : > { %s2373_s21 = smov %s1949_s22  ;;  %27 = sbr.rel (!%p25_p5) target bundleno = 9 (0x9), region = 121 }
 0x983   : > { %s2374_s22 = smov %s2369_s28 }
 0x987   :  { %1513 = vsyncpa [#allocation7], 1 }
 0x988   :  { %1515 = vsyncpa [#allocation7 + $0x1], 1 }

</bundles_post_ra>
